<compile_context>
chip_gen: v7x
topology: tpu7x:2x2x1
jax: 0.10.0
libtpu: 0.0.40
codegen_flags: <defaults>
</compile_context>

<pallas_src>
import functools

import jax
import jax.numpy as jnp
from jax.experimental import pallas as pl
from jax.experimental.pallas import tpu as pltpu

ACT_DTYPE = jnp.bfloat16          # MXU-native activations/weights
VMEM_LIMIT = 48 * 1024 * 1024     # safe on v7x (64 MiB physical); plenty for v5e/v6e
LN_EPS = 1e-12                    # BERT-style (HF default); torch nn.LayerNorm default is 1e-5


def _tile(dim, pref):
    """Largest divisor of `dim` that is <= pref (never silently full-dim blowups)."""
    if dim <= pref:
        return dim
    for t in range(pref, 0, -1):
        if dim % t == 0:
            return t
    return dim


# --------------------------- tiled matmul + bias ----------------------------

def matmul_bias_kernel(x_ref, w_ref, b_ref, o_ref, acc_ref):
    @pl.when(pl.program_id(2) == 0)
    def _():
        acc_ref[...] = jnp.zeros_like(acc_ref)

    acc_ref[...] += jnp.dot(x_ref[...], w_ref[...],
                            preferred_element_type=jnp.float32)

    @pl.when(pl.program_id(2) == pl.num_programs(2) - 1)
    def _():
        o_ref[...] = (acc_ref[...]
                      + b_ref[...].astype(jnp.float32)).astype(o_ref.dtype)


def matmul_bias(x, w, b, out_dtype=None, tm=512, tn=512, tk=256):
    """o = x @ w + b; x:(M,K), w:(K,N), b:(N,).  K-axis accumulation grid."""
    M, K = x.shape
    K2, N = w.shape
    assert K == K2
    out_dtype = out_dtype or x.dtype
    tm, tn, tk = _tile(M, tm), _tile(N, tn), _tile(K, tk)
    grid = (M // tm, N // tn, K // tk)
    isz = jnp.dtype(x.dtype).itemsize
    bytes_accessed = (M * K * isz + K * N * jnp.dtype(w.dtype).itemsize
                      + N * 4 + M * N * jnp.dtype(out_dtype).itemsize)
    return pl.pallas_call(
        matmul_bias_kernel,
        out_shape=jax.ShapeDtypeStruct((M, N), out_dtype),
        grid_spec=pltpu.PrefetchScalarGridSpec(
            num_scalar_prefetch=0,
            grid=grid,
            in_specs=[pl.BlockSpec((tm, tk), lambda i, j, k: (i, k)),
                      pl.BlockSpec((tk, tn), lambda i, j, k: (k, j)),
                      pl.BlockSpec((1, tn), lambda i, j, k: (0, j))],
            out_specs=pl.BlockSpec((tm, tn), lambda i, j, k: (i, j)),
            scratch_shapes=[pltpu.VMEM((tm, tn), jnp.float32)]),
        compiler_params=pltpu.CompilerParams(
            dimension_semantics=("parallel", "parallel", "arbitrary"),
            vmem_limit_bytes=VMEM_LIMIT),
        cost_estimate=pl.CostEstimate(flops=2 * M * N * K, transcendentals=0,
                                      bytes_accessed=bytes_accessed),
    )(x, w, b.reshape(1, N).astype(jnp.float32))


# ---------- tiled matmul + bias + residual + LayerNorm (fused epilogue) -------

def matmul_bias_res_ln_kernel(x_ref, w_ref, b_ref, r_ref, g_ref, bt_ref,
                              o_ref, acc_ref, *, eps):
    @pl.when(pl.program_id(1) == 0)
    def _():
        acc_ref[...] = jnp.zeros_like(acc_ref)

    acc_ref[...] += jnp.dot(x_ref[...], w_ref[...],
                            preferred_element_type=jnp.float32)

    @pl.when(pl.program_id(1) == pl.num_programs(1) - 1)
    def _():
        y = (acc_ref[...] + b_ref[...].astype(jnp.float32)
             + r_ref[...].astype(jnp.float32))
        mu = jnp.mean(y, axis=-1, keepdims=True)
        var = jnp.mean(jnp.square(y - mu), axis=-1, keepdims=True)
        y = (y - mu) * jax.lax.rsqrt(var + eps)
        o_ref[...] = (y * g_ref[...] + bt_ref[...]).astype(o_ref.dtype)


def matmul_bias_res_ln(x, w, b, residual, gamma, beta, eps=LN_EPS,
                       out_dtype=None, tm=512, tk=256):
    """o = LayerNorm(x @ w + b + residual); N == H is kept full-width."""
    M, K = x.shape
    K2, H = w.shape
    assert K == K2 and residual.shape == (M, H)
    out_dtype = out_dtype or x.dtype
    tm, tk = _tile(M, tm), _tile(K, tk)
    grid = (M // tm, K // tk)
    isz = jnp.dtype(x.dtype).itemsize
    bytes_accessed = M * K * isz + K * H * isz + 2 * M * H * isz + 3 * H * 4
    return pl.pallas_call(
        functools.partial(matmul_bias_res_ln_kernel, eps=eps),
        out_shape=jax.ShapeDtypeStruct((M, H), out_dtype),
        grid_spec=pltpu.PrefetchScalarGridSpec(
            num_scalar_prefetch=0,
            grid=grid,
            in_specs=[pl.BlockSpec((tm, tk), lambda i, k: (i, k)),
                      pl.BlockSpec((tk, H), lambda i, k: (k, 0)),
                      pl.BlockSpec((1, H), lambda i, k: (0, 0)),
                      pl.BlockSpec((tm, H), lambda i, k: (i, 0)),
                      pl.BlockSpec((1, H), lambda i, k: (0, 0)),
                      pl.BlockSpec((1, H), lambda i, k: (0, 0))],
            out_specs=pl.BlockSpec((tm, H), lambda i, k: (i, 0)),
            scratch_shapes=[pltpu.VMEM((tm, H), jnp.float32)]),
        compiler_params=pltpu.CompilerParams(
            dimension_semantics=("parallel", "arbitrary"),
            vmem_limit_bytes=VMEM_LIMIT),
        cost_estimate=pl.CostEstimate(flops=2 * M * H * K, transcendentals=0,
                                      bytes_accessed=bytes_accessed),
    )(x, w, b.reshape(1, H).astype(jnp.float32), residual,
      gamma.reshape(1, H).astype(jnp.float32),
      beta.reshape(1, H).astype(jnp.float32))


# -------- fused FFN1 + GELU + FFN2 + residual + LayerNorm (one pallas_call) ---

def ffn_res_ln_kernel(x_ref, w1_ref, b1_ref, w2_ref, b2_ref, r_ref, g_ref,
                      bt_ref, o_ref, acc_ref, *, eps):
    @pl.when(pl.program_id(1) == 0)
    def _():
        acc_ref[...] = jnp.zeros_like(acc_ref)

    h = jnp.dot(x_ref[...], w1_ref[...], preferred_element_type=jnp.float32)
    # TODO(synk): torch.nn.GELU defaults to exact erf; tanh approximation used
    # here for guaranteed Mosaic lowering (HF "gelu_new" variant).
    h = jax.nn.gelu(h + b1_ref[...].astype(jnp.float32), approximate=True)
    acc_ref[...] += jnp.dot(h.astype(w2_ref.dtype), w2_ref[...],
                            preferred_element_type=jnp.float32)

    @pl.when(pl.program_id(1) == pl.num_programs(1) - 1)
    def _():
        y = (acc_ref[...] + b2_ref[...].astype(jnp.float32)
             + r_ref[...].astype(jnp.float32))
        mu = jnp.mean(y, axis=-1, keepdims=True)
        var = jnp.mean(jnp.square(y - mu), axis=-1, keepdims=True)
        y = (y - mu) * jax.lax.rsqrt(var + eps)
        o_ref[...] = (y * g_ref[...] + bt_ref[...]).astype(o_ref.dtype)


def ffn_res_ln(x, w1, b1, w2, b2, residual, gamma, beta, eps=LN_EPS,
               out_dtype=None, tm=512, tf=512):
    """o = LayerNorm(gelu(x @ w1 + b1) @ w2 + b2 + residual); (M,4H) stays in VMEM."""
    M, H = x.shape
    H2, F = w1.shape
    assert H == H2 and w2.shape == (F, H) and residual.shape == (M, H)
    out_dtype = out_dtype or x.dtype
    tm, tf = _tile(M, tm), _tile(F, tf)
    grid = (M // tm, F // tf)
    isz = jnp.dtype(x.dtype).itemsize
    bytes_accessed = 3 * M * H * isz + 2 * H * F * isz + (F + 3 * H) * 4
    return pl.pallas_call(
        functools.partial(ffn_res_ln_kernel, eps=eps),
        out_shape=jax.ShapeDtypeStruct((M, H), out_dtype),
        grid_spec=pltpu.PrefetchScalarGridSpec(
            num_scalar_prefetch=0,
            grid=grid,
            in_specs=[pl.BlockSpec((tm, H), lambda i, f: (i, 0)),
                      pl.BlockSpec((H, tf), lambda i, f: (0, f)),
                      pl.BlockSpec((1, tf), lambda i, f: (0, f)),
                      pl.BlockSpec((tf, H), lambda i, f: (f, 0)),
                      pl.BlockSpec((1, H), lambda i, f: (0, 0)),
                      pl.BlockSpec((tm, H), lambda i, f: (i, 0)),
                      pl.BlockSpec((1, H), lambda i, f: (0, 0)),
                      pl.BlockSpec((1, H), lambda i, f: (0, 0))],
            out_specs=pl.BlockSpec((tm, H), lambda i, f: (i, 0)),
            scratch_shapes=[pltpu.VMEM((tm, H), jnp.float32)]),
        compiler_params=pltpu.CompilerParams(
            dimension_semantics=("parallel", "arbitrary"),
            vmem_limit_bytes=VMEM_LIMIT),
        cost_estimate=pl.CostEstimate(flops=4 * M * F * H, transcendentals=M * F,
                                      bytes_accessed=bytes_accessed),
    )(x, w1, b1.reshape(1, F).astype(jnp.float32),
      w2, b2.reshape(1, H).astype(jnp.float32), residual,
      gamma.reshape(1, H).astype(jnp.float32),
      beta.reshape(1, H).astype(jnp.float32))


# -------------------------- LayerNorm (embeddings only) ----------------------

def layernorm_kernel(x_ref, g_ref, b_ref, o_ref, *, eps):
    x = x_ref[...].astype(jnp.float32)
    mu = jnp.mean(x, axis=-1, keepdims=True)
    var = jnp.mean(jnp.square(x - mu), axis=-1, keepdims=True)
    y = (x - mu) * jax.lax.rsqrt(var + eps)
    o_ref[...] = (y * g_ref[...] + b_ref[...]).astype(o_ref.dtype)


def layernorm(x, gamma, beta, eps=LN_EPS, out_dtype=None, tm=1024):
    M, H = x.shape
    out_dtype = out_dtype or x.dtype
    tm = _tile(M, tm)
    row_spec = pl.BlockSpec((tm, H), lambda i: (i, 0))
    vec_spec = pl.BlockSpec((1, H), lambda i: (0, 0))
    return pl.pallas_call(
        functools.partial(layernorm_kernel, eps=eps),
        out_shape=jax.ShapeDtypeStruct((M, H), out_dtype),
        grid_spec=pltpu.PrefetchScalarGridSpec(
            num_scalar_prefetch=0, grid=(M // tm,),
            in_specs=[row_spec, vec_spec, vec_spec],
            out_specs=row_spec),
        compiler_params=pltpu.CompilerParams(
            dimension_semantics=("parallel",),
            vmem_limit_bytes=VMEM_LIMIT),
    )(x, gamma.reshape(1, H).astype(jnp.float32),
      beta.reshape(1, H).astype(jnp.float32))


# ----------------- multi-head attention: grid = (batch, head) ----------------

def attention_kernel(q_ref, k_ref, v_ref, m_ref, o_ref, *, scale):
    q = q_ref[0, 0] * scale               # fold 1/sqrt(Dh) into (S,Dh) tile
    k = k_ref[0, 0]
    v = v_ref[0, 0]
    mask = m_ref[0]                        # (1, S) additive, fp32
    s = jax.lax.dot_general(q, k, (((1,), (1,)), ((), ())),
                            preferred_element_type=jnp.float32)
    s = s + mask
    s = s - jnp.max(s, axis=-1, keepdims=True)
    p = jnp.exp(s)
    # After max-subtraction the row sum is >= 1, so the (EUP) approximate
    # reciprocal is safe even for fully-masked rows.
    p = p * pl.reciprocal(jnp.sum(p, axis=-1, keepdims=True), approx=True)
    o_ref[0, 0] = jnp.dot(p.astype(v.dtype), v,
                          preferred_element_type=jnp.float32).astype(o_ref.dtype)


def mha_attention(q, k, v, add_mask, scale):
    """q/k/v: (B, nh, S, Dh); add_mask: (B, 1, S) additive fp32 -> (B, nh, S, Dh)."""
    B, nh, S, Dh = q.shape
    # TODO(synk): flash-style KV tiling (online softmax) before S grows; pair
    # heads (2*Dh = 128 lanes) to fill the MXU contraction width.
    head_spec = pl.BlockSpec((1, 1, S, Dh), lambda b, h: (b, h, 0, 0))
    return pl.pallas_call(
        functools.partial(attention_kernel, scale=scale),
        out_shape=jax.ShapeDtypeStruct((B, nh, S, Dh), q.dtype),
        grid_spec=pltpu.PrefetchScalarGridSpec(
            num_scalar_prefetch=0, grid=(B, nh),
            in_specs=[head_spec, head_spec, head_spec,
                      pl.BlockSpec((1, 1, S), lambda b, h: (b, 0, 0))],
            out_specs=head_spec),
        compiler_params=pltpu.CompilerParams(
            dimension_semantics=("parallel", "parallel"),
            vmem_limit_bytes=VMEM_LIMIT),
        cost_estimate=pl.CostEstimate(
            flops=4 * B * nh * S * S * Dh,
            transcendentals=B * nh * S * S,
            bytes_accessed=4 * B * nh * S * Dh * jnp.dtype(q.dtype).itemsize
                           + B * S * 4),
    )(q, k, v, add_mask)


# ---------------------------- tiny classifier head ---------------------------

def classifier_kernel(x_ref, w_ref, b_ref, o_ref):
    o_ref[...] = (jnp.dot(x_ref[...], w_ref[...],
                          preferred_element_type=jnp.float32)
                  + b_ref[...]).astype(o_ref.dtype)


def classifier_head(x, w, b):
    """(B,H) @ (H,C) + b — single untiled pallas_call (C is tiny; no tiling)."""
    B, H = x.shape
    _, C = w.shape
    return pl.pallas_call(
        classifier_kernel,
        out_shape=jax.ShapeDtypeStruct((B, C), jnp.float32),
        compiler_params=pltpu.CompilerParams(vmem_limit_bytes=VMEM_LIMIT),
    )(x, w, b.reshape(1, C).astype(jnp.float32))


# ---------------------------- model definition ------------------------------

def init_params(key, vocab_size, max_pos, hidden, ffn, num_layers, num_classes):
    ks = iter(jax.random.split(key, 8 + 8 * num_layers))

    def w(shape, dtype=ACT_DTYPE):
        return (0.02 * jax.random.normal(next(ks), shape, jnp.float32)).astype(dtype)

    params = {
        "tok_emb": w((vocab_size, hidden), jnp.float32),
        "pos_emb": w((max_pos, hidden), jnp.float32),
        "emb_ln_g": jnp.ones((hidden,), jnp.float32),
        "emb_ln_b": jnp.zeros((hidden,), jnp.float32),
        "cls_w": w((hidden, num_classes)),
        "cls_b": jnp.zeros((num_classes,), jnp.float32),
        "layers": [],
    }
    for _ in range(num_layers):
        params["layers"].append({
            # fused Q|K|V projection, columns grouped [Q heads | K heads | V heads]
            "wqkv": w((hidden, 3 * hidden)),
            "bqkv": jnp.zeros((3 * hidden,), jnp.float32),
            "wo": w((hidden, hidden)), "bo": jnp.zeros((hidden,), jnp.float32),
            "ln1_g": jnp.ones((hidden,), jnp.float32),
            "ln1_b": jnp.zeros((hidden,), jnp.float32),
            "w1": w((hidden, ffn)), "b1": jnp.zeros((ffn,), jnp.float32),
            "w2": w((ffn, hidden)), "b2": jnp.zeros((hidden,), jnp.float32),
            "ln2_g": jnp.ones((hidden,), jnp.float32),
            "ln2_b": jnp.zeros((hidden,), jnp.float32),
        })
    return params


def transformer_classifier(params, input_ids, attention_mask, num_heads):
    B, S = input_ids.shape
    H = params["tok_emb"].shape[1]
    Dh = H // num_heads
    scale = 1.0 / (Dh ** 0.5)

    # ---- embeddings (gather is plain-JAX glue; LN runs in Pallas, bf16 out) ----
    x = params["tok_emb"][input_ids] + params["pos_emb"][:S][None, :, :]
    x = x.reshape(B * S, H).astype(ACT_DTYPE)
    x = layernorm(x, params["emb_ln_g"], params["emb_ln_b"])

    # additive attention mask: (B, 1, S), fp32
    add_mask = ((1.0 - attention_mask.astype(jnp.float32)) * -1e9)[:, None, :]

    for layer in params["layers"]:
        # fused QKV projection: one tiled matmul instead of three
        qkv = matmul_bias(x, layer["wqkv"], layer["bqkv"])            # (B*S, 3H)
        # head layout for the (B, nh) attention grid — wrapper reshape glue
        qkv = qkv.reshape(B, S, 3, num_heads, Dh).transpose(2, 0, 3, 1, 4)
        attn = mha_attention(qkv[0], qkv[1], qkv[2], add_mask, scale)  # (B,nh,S,Dh)
        attn = attn.transpose(0, 2, 1, 3).reshape(B * S, H)
        # wo projection with residual + LayerNorm fused into its epilogue
        x = matmul_bias_res_ln(attn, layer["wo"], layer["bo"], x,
                               layer["ln1_g"], layer["ln1_b"])
        # FFN1 + GELU + FFN2 + residual + LayerNorm in one pallas_call
        x = ffn_res_ln(x, layer["w1"], layer["b1"], layer["w2"], layer["b2"],
                       x, layer["ln2_g"], layer["ln2_b"])

    last_hidden_state = x.reshape(B, S, H)
    pooled = last_hidden_state[:, 0]                  # CLS token ([:, 0])
    # nn.Dropout(0.3): identity at inference
    logits = classifier_head(pooled, params["cls_w"], params["cls_b"])
    return logits


# ---------------------------------- main -------------------------------------

if __name__ == "__main__":
    vocab_size, max_pos = 100, 16
    hidden, num_heads, ffn, num_layers, num_classes = 32, 2, 64, 2, 3
    B, S = 2, 8

    key = jax.random.PRNGKey(0)
    k_params, k_ids = jax.random.split(key)
    params = init_params(k_params, vocab_size, max_pos, hidden, ffn,
                         num_layers, num_classes)

    input_ids = jax.random.randint(k_ids, (B, S), 0, vocab_size, dtype=jnp.int32)
    attention_mask = jnp.ones((B, S), dtype=jnp.int32)

    fwd = jax.jit(functools.partial(transformer_classifier, num_heads=num_heads))
    logits = fwd(params, input_ids, attention_mask)
    jax.block_until_ready(logits)
    assert logits.shape == (B, num_classes)
    print("KERNEL_OK")
</pallas_src>

<mosaic_0001>
module attributes {stable_mosaic.version = 11 : i64} {
  func.func @layernorm_kernel(%arg0: i32, %arg1: memref<16x32xbf16, #tpu.memory_space<vmem>>, %arg2: memref<1x32xf32, #tpu.memory_space<vmem>>, %arg3: memref<1x32xf32, #tpu.memory_space<vmem>>, %arg4: memref<16x32xbf16, #tpu.memory_space<vmem>>) attributes {dimension_semantics = [#tpu.dimension_semantics<parallel>], iteration_bounds = array<i64: 1>, scalar_prefetch = 0 : i64, scratch_operands = 0 : i64, tpu.core_type = #tpu.core_type<tc>, window_params = [{transform_indices = @transform_0, window_bounds = array<i64: 16, 32>}, {pipeline_mode = #tpu.pipeline_mode<synchronous>, transform_indices = @transform_1, window_bounds = array<i64: 1, 32>}, {pipeline_mode = #tpu.pipeline_mode<synchronous>, transform_indices = @transform_2, window_bounds = array<i64: 1, 32>}, {transform_indices = @transform_3, window_bounds = array<i64: 16, 32>}]} {
    %c0 = arith.constant 0 : index
    %c0_0 = arith.constant 0 : index
    %0 = vector.load %arg1[%c0, %c0_0] : memref<16x32xbf16, #tpu.memory_space<vmem>>, vector<16x32xbf16>
    %1 = arith.extf %0 : vector<16x32xbf16> to vector<16x32xf32>
    %cst = arith.constant dense<0.000000e+00> : vector<16xf32>
    %2 = vector.multi_reduction <add>, %1, %cst [1] : vector<16x32xf32> to vector<16xf32>
    %3 = vector.shape_cast %2 : vector<16xf32> to vector<16x1xf32>
    %cst_1 = arith.constant 3.200000e+01 : f32
    %4 = vector.broadcast %cst_1 : f32 to vector<16x1xf32>
    %5 = arith.divf %3, %4 : vector<16x1xf32>
    %6 = vector.broadcast %5 : vector<16x1xf32> to vector<16x32xf32>
    %7 = arith.subf %1, %6 : vector<16x32xf32>
    %8 = arith.mulf %7, %7 : vector<16x32xf32>
    %cst_2 = arith.constant dense<0.000000e+00> : vector<16xf32>
    %9 = vector.multi_reduction <add>, %8, %cst_2 [1] : vector<16x32xf32> to vector<16xf32>
    %10 = vector.shape_cast %9 : vector<16xf32> to vector<16x1xf32>
    %cst_3 = arith.constant 3.200000e+01 : f32
    %11 = vector.broadcast %cst_3 : f32 to vector<16x1xf32>
    %12 = arith.divf %10, %11 : vector<16x1xf32>
    %13 = vector.broadcast %5 : vector<16x1xf32> to vector<16x32xf32>
    %14 = arith.subf %1, %13 : vector<16x32xf32>
    %cst_4 = arith.constant 9.99999996E-13 : f32
    %15 = vector.broadcast %cst_4 : f32 to vector<16x1xf32>
    %16 = arith.addf %12, %15 : vector<16x1xf32>
    %17 = math.rsqrt %16 : vector<16x1xf32>
    %18 = vector.broadcast %17 : vector<16x1xf32> to vector<16x32xf32>
    %19 = arith.mulf %14, %18 : vector<16x32xf32>
    %c0_5 = arith.constant 0 : index
    %c0_6 = arith.constant 0 : index
    %20 = vector.load %arg2[%c0_5, %c0_6] : memref<1x32xf32, #tpu.memory_space<vmem>>, vector<1x32xf32>
    %21 = vector.broadcast %20 : vector<1x32xf32> to vector<16x32xf32>
    %22 = arith.mulf %19, %21 : vector<16x32xf32>
    %c0_7 = arith.constant 0 : index
    %c0_8 = arith.constant 0 : index
    %23 = vector.load %arg3[%c0_7, %c0_8] : memref<1x32xf32, #tpu.memory_space<vmem>>, vector<1x32xf32>
    %24 = vector.broadcast %23 : vector<1x32xf32> to vector<16x32xf32>
    %25 = arith.addf %22, %24 : vector<16x32xf32>
    %26 = arith.truncf %25 : vector<16x32xf32> to vector<16x32xbf16>
    %c0_9 = arith.constant 0 : index
    %c0_10 = arith.constant 0 : index
    %27 = vector.load %arg4[%c0_9, %c0_10] : memref<16x32xbf16, #tpu.memory_space<vmem>>, vector<16x32xbf16>
    tpu.vector_store %arg4[%c0_9, %c0_10], %26 {strides = array<i32>} : memref<16x32xbf16, #tpu.memory_space<vmem>>, vector<16x32xbf16>,
    return
  }
  func.func @transform_0(%arg0: i32) -> (i32, i32) {
    %c0_i32 = arith.constant 0 : i32
    %c0_i32_0 = arith.constant 0 : i32
    return %arg0, %c0_i32 : i32, i32
  }
  func.func @transform_1(%arg0: i32) -> (i32, i32) {
    %c0_i32 = arith.constant 0 : i32
    %c0_i32_0 = arith.constant 0 : i32
    %c0_i32_1 = arith.constant 0 : i32
    return %c0_i32, %c0_i32_0 : i32, i32
  }
  func.func @transform_2(%arg0: i32) -> (i32, i32) {
    %c0_i32 = arith.constant 0 : i32
    %c0_i32_0 = arith.constant 0 : i32
    %c0_i32_1 = arith.constant 0 : i32
    return %c0_i32, %c0_i32_0 : i32, i32
  }
  func.func @transform_3(%arg0: i32) -> (i32, i32) {
    %c0_i32 = arith.constant 0 : i32
    %c0_i32_0 = arith.constant 0 : i32
    return %arg0, %c0_i32 : i32, i32
  }
}

module attributes {stable_mosaic.version = 11 : i64} {
  func.func @matmul_bias_kernel(%arg0: i32, %arg1: i32, %arg2: i32, %arg3: memref<16x32xbf16, #tpu.memory_space<vmem>>, %arg4: memref<32x96xbf16, #tpu.memory_space<vmem>>, %arg5: memref<1x96xf32, #tpu.memory_space<vmem>>, %arg6: memref<16x96xbf16, #tpu.memory_space<vmem>>, %arg7: memref<16x96xf32, #tpu.memory_space<vmem>>) attributes {dimension_semantics = [#tpu.dimension_semantics<parallel>, #tpu.dimension_semantics<parallel>, #tpu.dimension_semantics<arbitrary>], iteration_bounds = array<i64: 1, 1, 1>, scalar_prefetch = 0 : i64, scratch_operands = 1 : i64, tpu.core_type = #tpu.core_type<tc>, window_params = [{transform_indices = @transform_0, window_bounds = array<i64: 16, 32>}, {transform_indices = @transform_1, window_bounds = array<i64: 32, 96>}, {transform_indices = @transform_2, window_bounds = array<i64: 1, 96>}, {transform_indices = @transform_3, window_bounds = array<i64: 16, 96>}]} {
    %c0_i32 = arith.constant 0 : i32
    %0 = arith.cmpi eq, %arg2, %c0_i32 : i32
    %1 = arith.extui %0 : i1 to i32
    %c0_i32_0 = arith.constant 0 : i32
    %2 = arith.cmpi ne, %1, %c0_i32_0 : i32
    scf.if %2 {
      %cst_10 = arith.constant 0.000000e+00 : f32
      %12 = vector.broadcast %cst_10 : f32 to vector<16x96xf32>
      %c0_11 = arith.constant 0 : index
      %c0_12 = arith.constant 0 : index
      %13 = vector.load %arg7[%c0_11, %c0_12] : memref<16x96xf32, #tpu.memory_space<vmem>>, vector<16x96xf32>
      tpu.vector_store %arg7[%c0_11, %c0_12], %12 {strides = array<i32>} : memref<16x96xf32, #tpu.memory_space<vmem>>, vector<16x96xf32>,
    } else {
    }
    %c0 = arith.constant 0 : index
    %c0_1 = arith.constant 0 : index
    %3 = vector.load %arg7[%c0, %c0_1] : memref<16x96xf32, #tpu.memory_space<vmem>>, vector<16x96xf32>
    %c0_2 = arith.constant 0 : index
    %c0_3 = arith.constant 0 : index
    %4 = vector.load %arg3[%c0_2, %c0_3] : memref<16x32xbf16, #tpu.memory_space<vmem>>, vector<16x32xbf16>
    %c0_4 = arith.constant 0 : index
    %c0_5 = arith.constant 0 : index
    %5 = vector.load %arg4[%c0_4, %c0_5] : memref<32x96xbf16, #tpu.memory_space<vmem>>, vector<32x96xbf16>
    %cst = arith.constant dense<0.000000e+00> : vector<16x96xf32>
    %6 = tpu.matmul %4, %5, %cst {dimension_numbers = #tpu.dot_dimension_numbers<[1], [0], [0], [1], [0, 0, 1, 1], [], []>} : vector<16x32xbf16>, vector<32x96xbf16>, vector<16x96xf32> -> vector<16x96xf32>
    %7 = arith.addf %3, %6 : vector<16x96xf32>
    %c0_6 = arith.constant 0 : index
    %c0_7 = arith.constant 0 : index
    %8 = vector.load %arg7[%c0_6, %c0_7] : memref<16x96xf32, #tpu.memory_space<vmem>>, vector<16x96xf32>
    tpu.vector_store %arg7[%c0_6, %c0_7], %7 {strides = array<i32>} : memref<16x96xf32, #tpu.memory_space<vmem>>, vector<16x96xf32>,
    %c0_i32_8 = arith.constant 0 : i32
    %9 = arith.cmpi eq, %arg2, %c0_i32_8 : i32
    %10 = arith.extui %9 : i1 to i32
    %c0_i32_9 = arith.constant 0 : i32
    %11 = arith.cmpi ne, %10, %c0_i32_9 : i32
    scf.if %11 {
      %c0_10 = arith.constant 0 : index
      %c0_11 = arith.constant 0 : index
      %12 = vector.load %arg7[%c0_10, %c0_11] : memref<16x96xf32, #tpu.memory_space<vmem>>, vector<16x96xf32>
      %c0_12 = arith.constant 0 : index
      %c0_13 = arith.constant 0 : index
      %13 = vector.load %arg5[%c0_12, %c0_13] : memref<1x96xf32, #tpu.memory_space<vmem>>, vector<1x96xf32>
      %14 = vector.broadcast %13 : vector<1x96xf32> to vector<16x96xf32>
      %15 = arith.addf %12, %14 : vector<16x96xf32>
      %16 = arith.truncf %15 : vector<16x96xf32> to vector<16x96xbf16>
      %c0_14 = arith.constant 0 : index
      %c0_15 = arith.constant 0 : index
      %17 = vector.load %arg6[%c0_14, %c0_15] : memref<16x96xbf16, #tpu.memory_space<vmem>>, vector<16x96xbf16>
      tpu.vector_store %arg6[%c0_14, %c0_15], %16 {strides = array<i32>} : memref<16x96xbf16, #tpu.memory_space<vmem>>, vector<16x96xbf16>,
    } else {
    }
    return
  }
  func.func @transform_0(%arg0: i32, %arg1: i32, %arg2: i32) -> (i32, i32) {
    %c0_i32 = arith.constant 0 : i32
    return %arg0, %arg2 : i32, i32
  }
  func.func @transform_1(%arg0: i32, %arg1: i32, %arg2: i32) -> (i32, i32) {
    %c0_i32 = arith.constant 0 : i32
    return %arg2, %arg1 : i32, i32
  }
  func.func @transform_2(%arg0: i32, %arg1: i32, %arg2: i32) -> (i32, i32) {
    %c0_i32 = arith.constant 0 : i32
    %c0_i32_0 = arith.constant 0 : i32
    return %c0_i32, %arg1 : i32, i32
  }
  func.func @transform_3(%arg0: i32, %arg1: i32, %arg2: i32) -> (i32, i32) {
    %c0_i32 = arith.constant 0 : i32
    return %arg0, %arg1 : i32, i32
  }
}

module attributes {stable_mosaic.version = 11 : i64} {
  func.func @attention_kernel(%arg0: i32, %arg1: i32, %arg2: memref<1x1x8x16xbf16, #tpu.memory_space<vmem>>, %arg3: memref<1x1x8x16xbf16, #tpu.memory_space<vmem>>, %arg4: memref<1x1x8x16xbf16, #tpu.memory_space<vmem>>, %arg5: memref<1x1x8xf32, #tpu.memory_space<vmem>>, %arg6: memref<1x1x8x16xbf16, #tpu.memory_space<vmem>>) attributes {dimension_semantics = [#tpu.dimension_semantics<parallel>, #tpu.dimension_semantics<parallel>], iteration_bounds = array<i64: 2, 2>, scalar_prefetch = 0 : i64, scratch_operands = 0 : i64, tpu.core_type = #tpu.core_type<tc>, window_params = [{transform_indices = @transform_0, window_bounds = array<i64: 1, 1, 8, 16>}, {transform_indices = @transform_1, window_bounds = array<i64: 1, 1, 8, 16>}, {transform_indices = @transform_2, window_bounds = array<i64: 1, 1, 8, 16>}, {transform_indices = @transform_3, window_bounds = array<i64: 1, 1, 8>}, {transform_indices = @transform_4, window_bounds = array<i64: 1, 1, 8, 16>}]} {
    %c0 = arith.constant 0 : index
    %c0_0 = arith.constant 0 : index
    %c0_1 = arith.constant 0 : index
    %c0_2 = arith.constant 0 : index
    %0 = vector.load %arg2[%c0, %c0_0, %c0_1, %c0_2] : memref<1x1x8x16xbf16, #tpu.memory_space<vmem>>, vector<1x1x8x16xbf16>
    %1 = vector.shape_cast %0 : vector<1x1x8x16xbf16> to vector<8x16xbf16>
    %cst = arith.constant 2.500000e-01 : bf16
    %2 = vector.broadcast %cst : bf16 to vector<8x16xbf16>
    %3 = arith.mulf %1, %2 : vector<8x16xbf16>
    %c0_3 = arith.constant 0 : index
    %c0_4 = arith.constant 0 : index
    %c0_5 = arith.constant 0 : index
    %c0_6 = arith.constant 0 : index
    %4 = vector.load %arg3[%c0_3, %c0_4, %c0_5, %c0_6] : memref<1x1x8x16xbf16, #tpu.memory_space<vmem>>, vector<1x1x8x16xbf16>
    %5 = vector.shape_cast %4 : vector<1x1x8x16xbf16> to vector<8x16xbf16>
    %c0_7 = arith.constant 0 : index
    %c0_8 = arith.constant 0 : index
    %c0_9 = arith.constant 0 : index
    %c0_10 = arith.constant 0 : index
    %6 = vector.load %arg4[%c0_7, %c0_8, %c0_9, %c0_10] : memref<1x1x8x16xbf16, #tpu.memory_space<vmem>>, vector<1x1x8x16xbf16>
    %7 = vector.shape_cast %6 : vector<1x1x8x16xbf16> to vector<8x16xbf16>
    %c0_11 = arith.constant 0 : index
    %c0_12 = arith.constant 0 : index
    %c0_13 = arith.constant 0 : index
    %8 = vector.load %arg5[%c0_11, %c0_12, %c0_13] : memref<1x1x8xf32, #tpu.memory_space<vmem>>, vector<1x1x8xf32>
    %9 = vector.shape_cast %8 : vector<1x1x8xf32> to vector<1x8xf32>
    %cst_14 = arith.constant dense<0.000000e+00> : vector<8x8xf32>
    %10 = tpu.matmul %3, %5, %cst_14 {dimension_numbers = #tpu.dot_dimension_numbers<[1], [1], [0], [0], [0, 0, 1, 0], [], []>} : vector<8x16xbf16>, vector<8x16xbf16>, vector<8x8xf32> -> vector<8x8xf32>
    %11 = vector.broadcast %9 : vector<1x8xf32> to vector<8x8xf32>
    %12 = arith.addf %10, %11 : vector<8x8xf32>
    %cst_15 = arith.constant dense<0xFF800000> : vector<8xf32>
    %13 = vector.multi_reduction <maximumf>, %12, %cst_15 [1] : vector<8x8xf32> to vector<8xf32>
    %14 = vector.shape_cast %13 : vector<8xf32> to vector<8x1xf32>
    %15 = vector.broadcast %14 : vector<8x1xf32> to vector<8x8xf32>
    %16 = arith.subf %12, %15 : vector<8x8xf32>
    %17 = math.exp %16 : vector<8x8xf32>
    %cst_16 = arith.constant dense<0.000000e+00> : vector<8xf32>
    %18 = vector.multi_reduction <add>, %17, %cst_16 [1] : vector<8x8xf32> to vector<8xf32>
    %19 = vector.shape_cast %18 : vector<8xf32> to vector<8x1xf32>
    %20 = tpu.reciprocal %19 {approx = true} : vector<8x1xf32> -> vector<8x1xf32>
    %21 = vector.broadcast %20 : vector<8x1xf32> to vector<8x8xf32>
    %22 = arith.mulf %17, %21 : vector<8x8xf32>
    %23 = arith.truncf %22 : vector<8x8xf32> to vector<8x8xbf16>
    %cst_17 = arith.constant dense<0.000000e+00> : vector<8x16xf32>
    %24 = tpu.matmul %23, %7, %cst_17 {dimension_numbers = #tpu.dot_dimension_numbers<[1], [0], [0], [1], [0, 0, 1, 1], [], []>} : vector<8x8xbf16>, vector<8x16xbf16>, vector<8x16xf32> -> vector<8x16xf32>
    %25 = arith.truncf %24 : vector<8x16xf32> to vector<8x16xbf16>
    %c0_18 = arith.constant 0 : index
    %c0_19 = arith.constant 0 : index
    %c0_20 = arith.constant 0 : index
    %c0_21 = arith.constant 0 : index
    %26 = vector.load %arg6[%c0_18, %c0_19, %c0_20, %c0_21] : memref<1x1x8x16xbf16, #tpu.memory_space<vmem>>, vector<1x1x8x16xbf16>
    %27 = vector.shape_cast %26 : vector<1x1x8x16xbf16> to vector<8x16xbf16>
    %28 = vector.shape_cast %25 : vector<8x16xbf16> to vector<1x1x8x16xbf16>
    tpu.vector_store %arg6[%c0_18, %c0_19, %c0_20, %c0_21], %28 {strides = array<i32>} : memref<1x1x8x16xbf16, #tpu.memory_space<vmem>>, vector<1x1x8x16xbf16>,
    return
  }
  func.func @transform_0(%arg0: i32, %arg1: i32) -> (i32, i32, i32, i32) {
    %c0_i32 = arith.constant 0 : i32
    %c0_i32_0 = arith.constant 0 : i32
    %c0_i32_1 = arith.constant 0 : i32
    return %arg0, %arg1, %c0_i32, %c0_i32_0 : i32, i32, i32, i32
  }
  func.func @transform_1(%arg0: i32, %arg1: i32) -> (i32, i32, i32, i32) {
    %c0_i32 = arith.constant 0 : i32
    %c0_i32_0 = arith.constant 0 : i32
    %c0_i32_1 = arith.constant 0 : i32
    return %arg0, %arg1, %c0_i32, %c0_i32_0 : i32, i32, i32, i32
  }
  func.func @transform_2(%arg0: i32, %arg1: i32) -> (i32, i32, i32, i32) {
    %c0_i32 = arith.constant 0 : i32
    %c0_i32_0 = arith.constant 0 : i32
    %c0_i32_1 = arith.constant 0 : i32
    return %arg0, %arg1, %c0_i32, %c0_i32_0 : i32, i32, i32, i32
  }
  func.func @transform_3(%arg0: i32, %arg1: i32) -> (i32, i32, i32) {
    %c0_i32 = arith.constant 0 : i32
    %c0_i32_0 = arith.constant 0 : i32
    %c0_i32_1 = arith.constant 0 : i32
    return %arg0, %c0_i32, %c0_i32_0 : i32, i32, i32
  }
  func.func @transform_4(%arg0: i32, %arg1: i32) -> (i32, i32, i32, i32) {
    %c0_i32 = arith.constant 0 : i32
    %c0_i32_0 = arith.constant 0 : i32
    %c0_i32_1 = arith.constant 0 : i32
    return %arg0, %arg1, %c0_i32, %c0_i32_0 : i32, i32, i32, i32
  }
}

module attributes {stable_mosaic.version = 11 : i64} {
  func.func @matmul_bias_res_ln_kernel(%arg0: i32, %arg1: i32, %arg2: memref<16x32xbf16, #tpu.memory_space<vmem>>, %arg3: memref<32x32xbf16, #tpu.memory_space<vmem>>, %arg4: memref<1x32xf32, #tpu.memory_space<vmem>>, %arg5: memref<16x32xbf16, #tpu.memory_space<vmem>>, %arg6: memref<1x32xf32, #tpu.memory_space<vmem>>, %arg7: memref<1x32xf32, #tpu.memory_space<vmem>>, %arg8: memref<16x32xbf16, #tpu.memory_space<vmem>>, %arg9: memref<16x32xf32, #tpu.memory_space<vmem>>) attributes {dimension_semantics = [#tpu.dimension_semantics<parallel>, #tpu.dimension_semantics<arbitrary>], iteration_bounds = array<i64: 1, 1>, scalar_prefetch = 0 : i64, scratch_operands = 1 : i64, tpu.core_type = #tpu.core_type<tc>, window_params = [{transform_indices = @transform_0, window_bounds = array<i64: 16, 32>}, {transform_indices = @transform_1, window_bounds = array<i64: 32, 32>}, {pipeline_mode = #tpu.pipeline_mode<synchronous>, transform_indices = @transform_2, window_bounds = array<i64: 1, 32>}, {transform_indices = @transform_3, window_bounds = array<i64: 16, 32>}, {pipeline_mode = #tpu.pipeline_mode<synchronous>, transform_indices = @transform_4, window_bounds = array<i64: 1, 32>}, {pipeline_mode = #tpu.pipeline_mode<synchronous>, transform_indices = @transform_5, window_bounds = array<i64: 1, 32>}, {transform_indices = @transform_6, window_bounds = array<i64: 16, 32>}]} {
    %c0_i32 = arith.constant 0 : i32
    %0 = arith.cmpi eq, %arg1, %c0_i32 : i32
    %1 = arith.extui %0 : i1 to i32
    %c0_i32_0 = arith.constant 0 : i32
    %2 = arith.cmpi ne, %1, %c0_i32_0 : i32
    scf.if %2 {
      %cst_10 = arith.constant 0.000000e+00 : f32
      %12 = vector.broadcast %cst_10 : f32 to vector<16x32xf32>
      %c0_11 = arith.constant 0 : index
      %c0_12 = arith.constant 0 : index
      %13 = vector.load %arg9[%c0_11, %c0_12] : memref<16x32xf32, #tpu.memory_space<vmem>>, vector<16x32xf32>
      tpu.vector_store %arg9[%c0_11, %c0_12], %12 {strides = array<i32>} : memref<16x32xf32, #tpu.memory_space<vmem>>, vector<16x32xf32>,
    } else {
    }
    %c0 = arith.constant 0 : index
    %c0_1 = arith.constant 0 : index
    %3 = vector.load %arg9[%c0, %c0_1] : memref<16x32xf32, #tpu.memory_space<vmem>>, vector<16x32xf32>
    %c0_2 = arith.constant 0 : index
    %c0_3 = arith.constant 0 : index
    %4 = vector.load %arg2[%c0_2, %c0_3] : memref<16x32xbf16, #tpu.memory_space<vmem>>, vector<16x32xbf16>
    %c0_4 = arith.constant 0 : index
    %c0_5 = arith.constant 0 : index
    %5 = vector.load %arg3[%c0_4, %c0_5] : memref<32x32xbf16, #tpu.memory_space<vmem>>, vector<32x32xbf16>
    %cst = arith.constant dense<0.000000e+00> : vector<16x32xf32>
    %6 = tpu.matmul %4, %5, %cst {dimension_numbers = #tpu.dot_dimension_numbers<[1], [0], [0], [1], [0, 0, 1, 1], [], []>} : vector<16x32xbf16>, vector<32x32xbf16>, vector<16x32xf32> -> vector<16x32xf32>
    %7 = arith.addf %3, %6 : vector<16x32xf32>
    %c0_6 = arith.constant 0 : index
    %c0_7 = arith.constant 0 : index
    %8 = vector.load %arg9[%c0_6, %c0_7] : memref<16x32xf32, #tpu.memory_space<vmem>>, vector<16x32xf32>
    tpu.vector_store %arg9[%c0_6, %c0_7], %7 {strides = array<i32>} : memref<16x32xf32, #tpu.memory_space<vmem>>, vector<16x32xf32>,
    %c0_i32_8 = arith.constant 0 : i32
    %9 = arith.cmpi eq, %arg1, %c0_i32_8 : i32
    %10 = arith.extui %9 : i1 to i32
    %c0_i32_9 = arith.constant 0 : i32
    %11 = arith.cmpi ne, %10, %c0_i32_9 : i32
    scf.if %11 {
      %c0_10 = arith.constant 0 : index
      %c0_11 = arith.constant 0 : index
      %12 = vector.load %arg9[%c0_10, %c0_11] : memref<16x32xf32, #tpu.memory_space<vmem>>, vector<16x32xf32>
      %c0_12 = arith.constant 0 : index
      %c0_13 = arith.constant 0 : index
      %13 = vector.load %arg4[%c0_12, %c0_13] : memref<1x32xf32, #tpu.memory_space<vmem>>, vector<1x32xf32>
      %14 = vector.broadcast %13 : vector<1x32xf32> to vector<16x32xf32>
      %15 = arith.addf %12, %14 : vector<16x32xf32>
      %c0_14 = arith.constant 0 : index
      %c0_15 = arith.constant 0 : index
      %16 = vector.load %arg5[%c0_14, %c0_15] : memref<16x32xbf16, #tpu.memory_space<vmem>>, vector<16x32xbf16>
      %17 = arith.extf %16 : vector<16x32xbf16> to vector<16x32xf32>
      %18 = arith.addf %15, %17 : vector<16x32xf32>
      %cst_16 = arith.constant dense<0.000000e+00> : vector<16xf32>
      %19 = vector.multi_reduction <add>, %18, %cst_16 [1] : vector<16x32xf32> to vector<16xf32>
      %20 = vector.shape_cast %19 : vector<16xf32> to vector<16x1xf32>
      %cst_17 = arith.constant 3.200000e+01 : f32
      %21 = vector.broadcast %cst_17 : f32 to vector<16x1xf32>
      %22 = arith.divf %20, %21 : vector<16x1xf32>
      %23 = vector.broadcast %22 : vector<16x1xf32> to vector<16x32xf32>
      %24 = arith.subf %18, %23 : vector<16x32xf32>
      %25 = arith.mulf %24, %24 : vector<16x32xf32>
      %cst_18 = arith.constant dense<0.000000e+00> : vector<16xf32>
      %26 = vector.multi_reduction <add>, %25, %cst_18 [1] : vector<16x32xf32> to vector<16xf32>
      %27 = vector.shape_cast %26 : vector<16xf32> to vector<16x1xf32>
      %cst_19 = arith.constant 3.200000e+01 : f32
      %28 = vector.broadcast %cst_19 : f32 to vector<16x1xf32>
      %29 = arith.divf %27, %28 : vector<16x1xf32>
      %30 = vector.broadcast %22 : vector<16x1xf32> to vector<16x32xf32>
      %31 = arith.subf %18, %30 : vector<16x32xf32>
      %cst_20 = arith.constant 9.99999996E-13 : f32
      %32 = vector.broadcast %cst_20 : f32 to vector<16x1xf32>
      %33 = arith.addf %29, %32 : vector<16x1xf32>
      %34 = math.rsqrt %33 : vector<16x1xf32>
      %35 = vector.broadcast %34 : vector<16x1xf32> to vector<16x32xf32>
      %36 = arith.mulf %31, %35 : vector<16x32xf32>
      %c0_21 = arith.constant 0 : index
      %c0_22 = arith.constant 0 : index
      %37 = vector.load %arg6[%c0_21, %c0_22] : memref<1x32xf32, #tpu.memory_space<vmem>>, vector<1x32xf32>
      %38 = vector.broadcast %37 : vector<1x32xf32> to vector<16x32xf32>
      %39 = arith.mulf %36, %38 : vector<16x32xf32>
      %c0_23 = arith.constant 0 : index
      %c0_24 = arith.constant 0 : index
      %40 = vector.load %arg7[%c0_23, %c0_24] : memref<1x32xf32, #tpu.memory_space<vmem>>, vector<1x32xf32>
      %41 = vector.broadcast %40 : vector<1x32xf32> to vector<16x32xf32>
      %42 = arith.addf %39, %41 : vector<16x32xf32>
      %43 = arith.truncf %42 : vector<16x32xf32> to vector<16x32xbf16>
      %c0_25 = arith.constant 0 : index
      %c0_26 = arith.constant 0 : index
      %44 = vector.load %arg8[%c0_25, %c0_26] : memref<16x32xbf16, #tpu.memory_space<vmem>>, vector<16x32xbf16>
      tpu.vector_store %arg8[%c0_25, %c0_26], %43 {strides = array<i32>} : memref<16x32xbf16, #tpu.memory_space<vmem>>, vector<16x32xbf16>,
    } else {
    }
    return
  }
  func.func @transform_0(%arg0: i32, %arg1: i32) -> (i32, i32) {
    %c0_i32 = arith.constant 0 : i32
    return %arg0, %arg1 : i32, i32
  }
  func.func @transform_1(%arg0: i32, %arg1: i32) -> (i32, i32) {
    %c0_i32 = arith.constant 0 : i32
    %c0_i32_0 = arith.constant 0 : i32
    return %arg1, %c0_i32 : i32, i32
  }
  func.func @transform_2(%arg0: i32, %arg1: i32) -> (i32, i32) {
    %c0_i32 = arith.constant 0 : i32
    %c0_i32_0 = arith.constant 0 : i32
    %c0_i32_1 = arith.constant 0 : i32
    return %c0_i32, %c0_i32_0 : i32, i32
  }
  func.func @transform_3(%arg0: i32, %arg1: i32) -> (i32, i32) {
    %c0_i32 = arith.constant 0 : i32
    %c0_i32_0 = arith.constant 0 : i32
    return %arg0, %c0_i32 : i32, i32
  }
  func.func @transform_4(%arg0: i32, %arg1: i32) -> (i32, i32) {
    %c0_i32 = arith.constant 0 : i32
    %c0_i32_0 = arith.constant 0 : i32
    %c0_i32_1 = arith.constant 0 : i32
    return %c0_i32, %c0_i32_0 : i32, i32
  }
  func.func @transform_5(%arg0: i32, %arg1: i32) -> (i32, i32) {
    %c0_i32 = arith.constant 0 : i32
    %c0_i32_0 = arith.constant 0 : i32
    %c0_i32_1 = arith.constant 0 : i32
    return %c0_i32, %c0_i32_0 : i32, i32
  }
  func.func @transform_6(%arg0: i32, %arg1: i32) -> (i32, i32) {
    %c0_i32 = arith.constant 0 : i32
    %c0_i32_0 = arith.constant 0 : i32
    return %arg0, %c0_i32 : i32, i32
  }
}

module attributes {stable_mosaic.version = 11 : i64} {
  func.func @classifier_kernel(%arg0: memref<2x32xbf16, #tpu.memory_space<vmem>>, %arg1: memref<32x3xbf16, #tpu.memory_space<vmem>>, %arg2: memref<1x3xf32, #tpu.memory_space<vmem>>, %arg3: memref<2x3xf32, #tpu.memory_space<vmem>>) attributes {dimension_semantics = [], scalar_prefetch = 0 : i64, scratch_operands = 0 : i64, tpu.core_type = #tpu.core_type<tc>} {
    %c0 = arith.constant 0 : index
    %c0_0 = arith.constant 0 : index
    %0 = vector.load %arg0[%c0, %c0_0] : memref<2x32xbf16, #tpu.memory_space<vmem>>, vector<2x32xbf16>
    %c0_1 = arith.constant 0 : index
    %c0_2 = arith.constant 0 : index
    %1 = vector.load %arg1[%c0_1, %c0_2] : memref<32x3xbf16, #tpu.memory_space<vmem>>, vector<32x3xbf16>
    %cst = arith.constant dense<0.000000e+00> : vector<2x3xf32>
    %2 = tpu.matmul %0, %1, %cst {dimension_numbers = #tpu.dot_dimension_numbers<[1], [0], [0], [1], [0, 0, 1, 1], [], []>} : vector<2x32xbf16>, vector<32x3xbf16>, vector<2x3xf32> -> vector<2x3xf32>
    %c0_3 = arith.constant 0 : index
    %c0_4 = arith.constant 0 : index
    %3 = vector.load %arg2[%c0_3, %c0_4] : memref<1x3xf32, #tpu.memory_space<vmem>>, vector<1x3xf32>
    %4 = vector.broadcast %3 : vector<1x3xf32> to vector<2x3xf32>
    %5 = arith.addf %2, %4 : vector<2x3xf32>
    %c0_5 = arith.constant 0 : index
    %c0_6 = arith.constant 0 : index
    %6 = vector.load %arg3[%c0_5, %c0_6] : memref<2x3xf32, #tpu.memory_space<vmem>>, vector<2x3xf32>
    tpu.vector_store %arg3[%c0_5, %c0_6], %5 {strides = array<i32>} : memref<2x3xf32, #tpu.memory_space<vmem>>, vector<2x3xf32>,
    return
  }
}

module attributes {stable_mosaic.version = 11 : i64} {
  func.func @ffn_res_ln_kernel(%arg0: i32, %arg1: i32, %arg2: memref<16x32xbf16, #tpu.memory_space<vmem>>, %arg3: memref<32x64xbf16, #tpu.memory_space<vmem>>, %arg4: memref<1x64xf32, #tpu.memory_space<vmem>>, %arg5: memref<64x32xbf16, #tpu.memory_space<vmem>>, %arg6: memref<1x32xf32, #tpu.memory_space<vmem>>, %arg7: memref<16x32xbf16, #tpu.memory_space<vmem>>, %arg8: memref<1x32xf32, #tpu.memory_space<vmem>>, %arg9: memref<1x32xf32, #tpu.memory_space<vmem>>, %arg10: memref<16x32xbf16, #tpu.memory_space<vmem>>, %arg11: memref<16x32xf32, #tpu.memory_space<vmem>>) attributes {dimension_semantics = [#tpu.dimension_semantics<parallel>, #tpu.dimension_semantics<arbitrary>], iteration_bounds = array<i64: 1, 1>, scalar_prefetch = 0 : i64, scratch_operands = 1 : i64, tpu.core_type = #tpu.core_type<tc>, window_params = [{transform_indices = @transform_0, window_bounds = array<i64: 16, 32>}, {transform_indices = @transform_1, window_bounds = array<i64: 32, 64>}, {transform_indices = @transform_2, window_bounds = array<i64: 1, 64>}, {transform_indices = @transform_3, window_bounds = array<i64: 64, 32>}, {pipeline_mode = #tpu.pipeline_mode<synchronous>, transform_indices = @transform_4, window_bounds = array<i64: 1, 32>}, {transform_indices = @transform_5, window_bounds = array<i64: 16, 32>}, {pipeline_mode = #tpu.pipeline_mode<synchronous>, transform_indices = @transform_6, window_bounds = array<i64: 1, 32>}, {pipeline_mode = #tpu.pipeline_mode<synchronous>, transform_indices = @transform_7, window_bounds = array<i64: 1, 32>}, {transform_indices = @transform_8, window_bounds = array<i64: 16, 32>}]} {
    %c0_i32 = arith.constant 0 : i32
    %0 = arith.cmpi eq, %arg1, %c0_i32 : i32
    %1 = arith.extui %0 : i1 to i32
    %c0_i32_0 = arith.constant 0 : i32
    %2 = arith.cmpi ne, %1, %c0_i32_0 : i32
    scf.if %2 {
      %cst_19 = arith.constant 0.000000e+00 : f32
      %31 = vector.broadcast %cst_19 : f32 to vector<16x32xf32>
      %c0_20 = arith.constant 0 : index
      %c0_21 = arith.constant 0 : index
      %32 = vector.load %arg11[%c0_20, %c0_21] : memref<16x32xf32, #tpu.memory_space<vmem>>, vector<16x32xf32>
      tpu.vector_store %arg11[%c0_20, %c0_21], %31 {strides = array<i32>} : memref<16x32xf32, #tpu.memory_space<vmem>>, vector<16x32xf32>,
    } else {
    }
    %c0 = arith.constant 0 : index
    %c0_1 = arith.constant 0 : index
    %3 = vector.load %arg2[%c0, %c0_1] : memref<16x32xbf16, #tpu.memory_space<vmem>>, vector<16x32xbf16>
    %c0_2 = arith.constant 0 : index
    %c0_3 = arith.constant 0 : index
    %4 = vector.load %arg3[%c0_2, %c0_3] : memref<32x64xbf16, #tpu.memory_space<vmem>>, vector<32x64xbf16>
    %cst = arith.constant dense<0.000000e+00> : vector<16x64xf32>
    %5 = tpu.matmul %3, %4, %cst {dimension_numbers = #tpu.dot_dimension_numbers<[1], [0], [0], [1], [0, 0, 1, 1], [], []>} : vector<16x32xbf16>, vector<32x64xbf16>, vector<16x64xf32> -> vector<16x64xf32>
    %c0_4 = arith.constant 0 : index
    %c0_5 = arith.constant 0 : index
    %6 = vector.load %arg4[%c0_4, %c0_5] : memref<1x64xf32, #tpu.memory_space<vmem>>, vector<1x64xf32>
    %7 = vector.broadcast %6 : vector<1x64xf32> to vector<16x64xf32>
    %8 = arith.addf %5, %7 : vector<16x64xf32>
    %9 = arith.mulf %8, %8 : vector<16x64xf32>
    %10 = arith.mulf %8, %9 : vector<16x64xf32>
    %cst_6 = arith.constant 4.471500e-02 : f32
    %11 = vector.broadcast %cst_6 : f32 to vector<16x64xf32>
    %12 = arith.mulf %11, %10 : vector<16x64xf32>
    %13 = arith.addf %8, %12 : vector<16x64xf32>
    %cst_7 = arith.constant 0.797884583 : f32
    %14 = vector.broadcast %cst_7 : f32 to vector<16x64xf32>
    %15 = arith.mulf %14, %13 : vector<16x64xf32>
    %16 = math.tanh %15 : vector<16x64xf32>
    %cst_8 = arith.constant 1.000000e+00 : f32
    %17 = vector.broadcast %cst_8 : f32 to vector<16x64xf32>
    %18 = arith.addf %17, %16 : vector<16x64xf32>
    %cst_9 = arith.constant 5.000000e-01 : f32
    %19 = vector.broadcast %cst_9 : f32 to vector<16x64xf32>
    %20 = arith.mulf %19, %18 : vector<16x64xf32>
    %21 = arith.mulf %8, %20 : vector<16x64xf32>
    %c0_10 = arith.constant 0 : index
    %c0_11 = arith.constant 0 : index
    %22 = vector.load %arg11[%c0_10, %c0_11] : memref<16x32xf32, #tpu.memory_space<vmem>>, vector<16x32xf32>
    %23 = arith.truncf %21 : vector<16x64xf32> to vector<16x64xbf16>
    %c0_12 = arith.constant 0 : index
    %c0_13 = arith.constant 0 : index
    %24 = vector.load %arg5[%c0_12, %c0_13] : memref<64x32xbf16, #tpu.memory_space<vmem>>, vector<64x32xbf16>
    %cst_14 = arith.constant dense<0.000000e+00> : vector<16x32xf32>
    %25 = tpu.matmul %23, %24, %cst_14 {dimension_numbers = #tpu.dot_dimension_numbers<[1], [0], [0], [1], [0, 0, 1, 1], [], []>} : vector<16x64xbf16>, vector<64x32xbf16>, vector<16x32xf32> -> vector<16x32xf32>
    %26 = arith.addf %22, %25 : vector<16x32xf32>
    %c0_15 = arith.constant 0 : index
    %c0_16 = arith.constant 0 : index
    %27 = vector.load %arg11[%c0_15, %c0_16] : memref<16x32xf32, #tpu.memory_space<vmem>>, vector<16x32xf32>
    tpu.vector_store %arg11[%c0_15, %c0_16], %26 {strides = array<i32>} : memref<16x32xf32, #tpu.memory_space<vmem>>, vector<16x32xf32>,
    %c0_i32_17 = arith.constant 0 : i32
    %28 = arith.cmpi eq, %arg1, %c0_i32_17 : i32
    %29 = arith.extui %28 : i1 to i32
    %c0_i32_18 = arith.constant 0 : i32
    %30 = arith.cmpi ne, %29, %c0_i32_18 : i32
    scf.if %30 {
      %c0_19 = arith.constant 0 : index
      %c0_20 = arith.constant 0 : index
      %31 = vector.load %arg11[%c0_19, %c0_20] : memref<16x32xf32, #tpu.memory_space<vmem>>, vector<16x32xf32>
      %c0_21 = arith.constant 0 : index
      %c0_22 = arith.constant 0 : index
      %32 = vector.load %arg6[%c0_21, %c0_22] : memref<1x32xf32, #tpu.memory_space<vmem>>, vector<1x32xf32>
      %33 = vector.broadcast %32 : vector<1x32xf32> to vector<16x32xf32>
      %34 = arith.addf %31, %33 : vector<16x32xf32>
      %c0_23 = arith.constant 0 : index
      %c0_24 = arith.constant 0 : index
      %35 = vector.load %arg7[%c0_23, %c0_24] : memref<16x32xbf16, #tpu.memory_space<vmem>>, vector<16x32xbf16>
      %36 = arith.extf %35 : vector<16x32xbf16> to vector<16x32xf32>
      %37 = arith.addf %34, %36 : vector<16x32xf32>
      %cst_25 = arith.constant dense<0.000000e+00> : vector<16xf32>
      %38 = vector.multi_reduction <add>, %37, %cst_25 [1] : vector<16x32xf32> to vector<16xf32>
      %39 = vector.shape_cast %38 : vector<16xf32> to vector<16x1xf32>
      %cst_26 = arith.constant 3.200000e+01 : f32
      %40 = vector.broadcast %cst_26 : f32 to vector<16x1xf32>
      %41 = arith.divf %39, %40 : vector<16x1xf32>
      %42 = vector.broadcast %41 : vector<16x1xf32> to vector<16x32xf32>
      %43 = arith.subf %37, %42 : vector<16x32xf32>
      %44 = arith.mulf %43, %43 : vector<16x32xf32>
      %cst_27 = arith.constant dense<0.000000e+00> : vector<16xf32>
      %45 = vector.multi_reduction <add>, %44, %cst_27 [1] : vector<16x32xf32> to vector<16xf32>
      %46 = vector.shape_cast %45 : vector<16xf32> to vector<16x1xf32>
      %cst_28 = arith.constant 3.200000e+01 : f32
      %47 = vector.broadcast %cst_28 : f32 to vector<16x1xf32>
      %48 = arith.divf %46, %47 : vector<16x1xf32>
      %49 = vector.broadcast %41 : vector<16x1xf32> to vector<16x32xf32>
      %50 = arith.subf %37, %49 : vector<16x32xf32>
      %cst_29 = arith.constant 9.99999996E-13 : f32
      %51 = vector.broadcast %cst_29 : f32 to vector<16x1xf32>
      %52 = arith.addf %48, %51 : vector<16x1xf32>
      %53 = math.rsqrt %52 : vector<16x1xf32>
      %54 = vector.broadcast %53 : vector<16x1xf32> to vector<16x32xf32>
      %55 = arith.mulf %50, %54 : vector<16x32xf32>
      %c0_30 = arith.constant 0 : index
      %c0_31 = arith.constant 0 : index
      %56 = vector.load %arg8[%c0_30, %c0_31] : memref<1x32xf32, #tpu.memory_space<vmem>>, vector<1x32xf32>
      %57 = vector.broadcast %56 : vector<1x32xf32> to vector<16x32xf32>
      %58 = arith.mulf %55, %57 : vector<16x32xf32>
      %c0_32 = arith.constant 0 : index
      %c0_33 = arith.constant 0 : index
      %59 = vector.load %arg9[%c0_32, %c0_33] : memref<1x32xf32, #tpu.memory_space<vmem>>, vector<1x32xf32>
      %60 = vector.broadcast %59 : vector<1x32xf32> to vector<16x32xf32>
      %61 = arith.addf %58, %60 : vector<16x32xf32>
      %62 = arith.truncf %61 : vector<16x32xf32> to vector<16x32xbf16>
      %c0_34 = arith.constant 0 : index
      %c0_35 = arith.constant 0 : index
      %63 = vector.load %arg10[%c0_34, %c0_35] : memref<16x32xbf16, #tpu.memory_space<vmem>>, vector<16x32xbf16>
      tpu.vector_store %arg10[%c0_34, %c0_35], %62 {strides = array<i32>} : memref<16x32xbf16, #tpu.memory_space<vmem>>, vector<16x32xbf16>,
    } else {
    }
    return
  }
  func.func @transform_0(%arg0: i32, %arg1: i32) -> (i32, i32) {
    %c0_i32 = arith.constant 0 : i32
    %c0_i32_0 = arith.constant 0 : i32
    return %arg0, %c0_i32 : i32, i32
  }
  func.func @transform_1(%arg0: i32, %arg1: i32) -> (i32, i32) {
    %c0_i32 = arith.constant 0 : i32
    %c0_i32_0 = arith.constant 0 : i32
    return %c0_i32, %arg1 : i32, i32
  }
  func.func @transform_2(%arg0: i32, %arg1: i32) -> (i32, i32) {
    %c0_i32 = arith.constant 0 : i32
    %c0_i32_0 = arith.constant 0 : i32
    return %c0_i32, %arg1 : i32, i32
  }
  func.func @transform_3(%arg0: i32, %arg1: i32) -> (i32, i32) {
    %c0_i32 = arith.constant 0 : i32
    %c0_i32_0 = arith.constant 0 : i32
    return %arg1, %c0_i32 : i32, i32
  }
  func.func @transform_4(%arg0: i32, %arg1: i32) -> (i32, i32) {
    %c0_i32 = arith.constant 0 : i32
    %c0_i32_0 = arith.constant 0 : i32
    %c0_i32_1 = arith.constant 0 : i32
    return %c0_i32, %c0_i32_0 : i32, i32
  }
  func.func @transform_5(%arg0: i32, %arg1: i32) -> (i32, i32) {
    %c0_i32 = arith.constant 0 : i32
    %c0_i32_0 = arith.constant 0 : i32
    return %arg0, %c0_i32 : i32, i32
  }
  func.func @transform_6(%arg0: i32, %arg1: i32) -> (i32, i32) {
    %c0_i32 = arith.constant 0 : i32
    %c0_i32_0 = arith.constant 0 : i32
    %c0_i32_1 = arith.constant 0 : i32
    return %c0_i32, %c0_i32_0 : i32, i32
  }
  func.func @transform_7(%arg0: i32, %arg1: i32) -> (i32, i32) {
    %c0_i32 = arith.constant 0 : i32
    %c0_i32_0 = arith.constant 0 : i32
    %c0_i32_1 = arith.constant 0 : i32
    return %c0_i32, %c0_i32_0 : i32, i32
  }
  func.func @transform_8(%arg0: i32, %arg1: i32) -> (i32, i32) {
    %c0_i32 = arith.constant 0 : i32
    %c0_i32_0 = arith.constant 0 : i32
    return %arg0, %c0_i32 : i32, i32
  }
}

</mosaic_0001>

<bundles_post_ra>
// kernel: transformer_classifier.12
= control target key start
LH: loop header
LB: loop body
LE: loop exit
PB: predicated region body
PF: predicated region fallthrough
CT: control target
= control target key end

     0   :  { %s706_s15 = smov 0   ;;  %s708_s16 = smov 0   ;;  %s775_s0 = inlined_call_operand.vmem [shape: bf16[2,2,8,16], index: 0, kind: input, shape index: {}]   ;;  %s776_s1 = inlined_call_operand.vmem [shape: bf16[2,2,8,16], index: 1, kind: input, shape index: {}]   ;;  %s777_s2 = inlined_call_operand.vmem [shape: bf16[2,2,8,16], index: 2, kind: input, shape index: {}]   ;;  %s778_s3 = inlined_call_operand.vmem [shape: f32[2,1,8], index: 3, kind: input, shape index: {}]   ;;  %s779_s4 = inlined_call_operand.vmem [shape: bf16[2,2,8,16], index: 4, kind: output, shape index: {}]  }
   0x1   :  { %s710_s17 = smov 0   ;;  %s712_s18 = smov 0  }
   0x2   :  { %s714_s19 = smov 0  }
   0x3 LB: > { %s23_s20 = sadd.s32 1, %s669_s17  ;;  %s26_s21 = sadd.s32 1, %s673_s18  ;;  %s677_s19 = sphi %s714_s19, %s14_s19   ;;  %s673_s18 = sphi %s712_s18, %s783_s18   ;;  %s669_s17 = sphi %s710_s17, %s782_s17   ;;  %s665_s16 = sphi %s708_s16, %s781_s16   ;;  %s661_s15 = sphi %s706_s15, %s780_s15  }
   0x4   : > { %p24_p0 = scmp.ge.s32.totalorder %s23_s20, 2  ;;  %p563_p1 = scmp.ge.s32.totalorder %s677_s19, 1 }
   0x5   : > { %p219_p2 = scmp.lt.s32.totalorder %s677_s19, 5 }
   0x6   : > { %s785_s20 = smov (%p24_p0, %s23_s20), 0  ;;  %s787_s21 = smov (!%p24_p0, %s26_s21), %s673_s18 }
   0x7   : > { %p220_p3 = pnand %p563_p1, %p219_p2  ;;  %p28_p4 = scmp.ge.s32.totalorder %s787_s21, 2 }
   0x8   : > { %p270_p5 = scmp.lt.s32.totalorder (!%p220_p3), %s665_s16, 1  ;;  %p272_p6 = scmp.lt.s32.totalorder (!%p220_p3), %s661_s15, 1  ;;  %v679_v0 = vmov (!%p220_p3), 0.0   ;;  %vm680_vm0 = vmmov (!%p220_p3), 0   ;;  %vm318_vm1 = vcmask (!%p220_p3), 130048   ;;  %vm365_vm2 = vcmask (!%p220_p3), 64512  }
   0x9   : > { %s789_s21 = smov (%p28_p4, %s787_s21), 0  ;;  %223 = sbr.rel (%p220_p3) target bundleno = 775 (0x307), region = 36 }
   0xa   : > { %581 = vmatprep.subr.bf16.mxu0 (!%p220_p3), %v679_v0  ;;  %583 = vmatprep.mubr.msk.bf16.mxu0 (!%p220_p3), %vm680_vm0, %v679_v0  ;;  %vm381_vm3 = vcmask (!%p220_p3), 1043456   ;;  %vm426_vm4 = vcmask (!%p220_p3), 125952  }
   0xb   : > { %587 = vmatprep.subr.bf16.mxu1 (!%p220_p3), %v679_v0  ;;  %589 = vmatprep.mubr.msk.bf16.mxu1 (!%p220_p3), %vm680_vm0, %v679_v0 }
  0x10   : > { %s791_s16 = smov (!%p270_p5, %s665_s16), 1  ;;  %s793_s15 = smov (!%p272_p6, %s661_s15), 1 }
  0x11   : > { %s564_s22 = sshll.u32 %s791_s16, 1  ;;  %s296_s7 = scalar_lea.vmem %s778_s3, %s791_s16 }
  0x12   : > { %s275_s23 = sadd.s32 %s564_s22, %s793_s15  ;;  %v572_v5 = vld [vmem:[%s296_s7] ss:$0 sm:$0xff] }
  0x13   : > { %s736_s24 = sshll.u32 %s275_s23, 2 }
  0x14   : > { %s285_s27 = scalar_lea.vmem %s776_s1, %s736_s24  ;;  %s277_s30 = scalar_lea.vmem %s775_s0, %s736_s24 }
  0x15   : > { %v309_v1 = vld [vmem:[%s285_s27] sm:$0xf]  ;;  %s293_s10 = scalar_lea.vmem %s777_s2, %s736_s24  ;;  %s304_s13 = scalar_lea.vmem %s779_s4, %s736_s24 }
  0x16   : > { %v323_v2 = vsel %vm318_vm1, %v309_v1, 0  ;;  %v307_v3 = vld [vmem:[%s277_s30] sm:$0xf] }
  0x17   : > { %582 = vmatpush3.bf16.xpose.msra.mxu0 %v323_v2  ;;  %v308_v4 = vmul.bf16 1048592000, %v307_v3  ;;  %v310_v17 = vld [vmem:[%s293_s10] sm:$0xf] }
  0x18   : > { %v383_v18 = vsel %vm381_vm3, %v310_v17, 0 }
  0x19   : > { %588 = vmatpush3.bf16.msra.mxu1 %v383_v18 }
  0x1e   : > { %584 = vmatmul.mubr.msk.bf16.vlgmr.msra.gmra.mrb[0].mxu0 %vm318_vm1, %v308_v4 }
  0xf1   : > { %v359_v6 = vpop.f32.mrb[0].mxu0 }
  0xf2   : > { %v360_v7 = vadd.f32 %v572_v5, %v359_v6  ;;  %v585_v8 = vpop.f32.mrb[1].mxu0 }
  0xf3   : > { %v362_v9 = vpop.f32.mrb[2].mxu0 }
  0xf4   : > { %v586_v10 = vpop.f32.mrb[3].mxu0  ;;  %v366_v11 = vsel %vm365_vm2, %v360_v7, -inf }
  0xf5   : > { %367 = vmax.xlane.f32.xlu0 %v366_v11 }
 0x182   : > { %v368_v12 = vpop.xlane.xlu0 %367 }
 0x183   : > { %v369_v13 = vsub.f32 %v360_v7, %v368_v12 }
 0x185   : > { %v370_v14 = vmul.f32 1.442695, %v369_v13 }
 0x187   : > { %635 = vpow2.f32 %v370_v14 }
 0x191   : > { %v636_v15 = vpop.eup %635 }
 0x192   : > { %v372_v16 = vsel %vm365_vm2, %v636_v15, 0.0 }
 0x193   : > { %373 = vadd.xlane.f32.xlu0 %v372_v16 }
 0x220   : > { %v374_v19 = vpop.xlane.xlu0 %373 }
 0x221   : > { %637 = vrcp.f32 %v374_v19 }
 0x22b   : > { %v638_v20 = vpop.eup %637 }
 0x22c   : > { %v376_v21 = vmul.f32 %v638_v20, %v636_v15 }
 0x22e   : > { %v377_v22 = vpack.c.bf16 %v376_v21, %v376_v21 }
 0x230   : > { %590 = vmatmul.mubr.msk.bf16.vlgmr.msra.gmra.mrb[0].mxu1 %vm365_vm2, %v377_v22 }
 0x303   : > { %v419_v23 = vpop.f32.mrb[0].mxu1 }
 0x304   : > { %v425_v24 = vpack.c.bf16 %v419_v23, %v419_v23  ;;  %v591_v25 = vpop.f32.mrb[1].mxu1 }
 0x305   : > { %v422_v26 = vpop.f32.mrb[2].mxu1 }
 0x306   : > { %427 = vst.msk [vmem:[%s304_s13] sm:$0xf] %vm426_vm4, %v425_v24  ;;  %v592_v27 = vpop.f32.mrb[3].mxu1 }
 0x307 PF: > { %s14_s19 = sadd.s32 1, %s677_s19   ;;  %s780_s15 = smov %s669_s17 }
 0x308   : > { %p11_p7 = scmp.ge.s32.totalorder %s14_s19, 6   ;;  %s781_s16 = smov %s673_s18 }
 0x309   : > { %s782_s17 = smov %s785_s20  ;;  %s783_s18 = smov %s789_s21 }
 0x30a   :  { %13 = sbr.rel (!%p11_p7) target bundleno = 3 (0x3), region = 75 }

// kernel: transformer_classifier.11
= control target key start
LH: loop header
LB: loop body
LE: loop exit
PB: predicated region body
PF: predicated region fallthrough
CT: control target
= control target key end

     0   :  { %vm19_vm0 = vcmask 785408   ;;  %v151_v0 = vmov 0.0   ;;  %vm152_vm1 = vmmov 0   ;;  %vm47_vm2 = vcmask 261120   ;;  %s195_s1 = inlined_call_operand.vmem [shape: bf16[32,96], index: 1, kind: input, shape index: {}]   ;;  %s196_s0 = inlined_call_operand.vmem [shape: bf16[16,32], index: 0, kind: input, shape index: {}]   ;;  %s197_s2 = inlined_call_operand.vmem [shape: f32[1,96], index: 2, kind: input, shape index: {}]   ;;  %s198_s3 = inlined_call_operand.vmem [shape: bf16[16,96], index: 3, kind: output, shape index: {}]  }
   0x1   :  { %138 = vmatprep.subr.bf16.mxu0 %v151_v0  ;;  %v148_v1 = vld [vmem:[%s195_s1] sm:$0xff]   ;;  %142 = vmatprep.mubr.msk.bf16.mxu0 %vm152_vm1, %v151_v0  ;;  %20 = vst.msk [vmem:[#allocation2] sm:$0xff] %vm19_vm0, %v151_v0  ;;  %21 = vst.msk [vmem:[#allocation2 + $0x8] sm:$0xff] %vm19_vm0, %v151_v0  ;;  %v149_v2 = vld [vmem:[%s195_s1 + $0x8] sm:$0xff]   ;;  %vm119_vm3 = vcmask 781312  }
   0x2   :  { %139 = vmatpush3.bf16.msra.mxu0 %v148_v1  ;;  %v150_v3 = vld [vmem:[%s196_s0] sm:$0xff]  }
   0x3   :  { %140 = vmatprep.subr.bf16.mxu0 %v151_v0  ;;  %v130_v12 = vld [vmem:[%s197_s2] ss:$0 sm:$0xff] }
   0x6   :  { %141 = vmatpush3.bf16.msra.mxu0 %v149_v2 }
   0x8   :  { %v22_v4 = vld [vmem:[#allocation2] sm:$0xff]  ;;  %v23_v6 = vld [vmem:[#allocation2 + $0x8] sm:$0xff] }
   0x9   :  { %143 = vmatmul.mubr.msk.bf16.vlgmr.msra.gmra.mrb[0].mxu0 %vm47_vm2, %v150_v3 }
  0xdc   :  { %v85_v5 = vpop.f32.mrb[0].mxu0 }
  0xdd   :  { %v92_v7 = vadd.f32 %v85_v5, %v22_v4  ;;  %v144_v8 = vpop.f32.mrb[1].mxu0 }
  0xde   :  { %v88_v9 = vpop.f32.mrb[2].mxu0 }
  0xdf   :  { %95 = vst.msk [vmem:[#allocation2] sm:$0xff] %vm19_vm0, %v92_v7  ;;  %v93_v10 = vadd.f32 %v88_v9, %v23_v6  ;;  %v145_v11 = vpop.f32.mrb[3].mxu0 }
  0xe1   :  { %96 = vst.msk [vmem:[#allocation2 + $0x8] sm:$0xff] %vm19_vm0, %v93_v10 }
  0xe6   :  { %v100_v13 = vld [vmem:[#allocation2] sm:$0xff] }
  0xe7   :  { %v109_v14 = vadd.f32 %v130_v12, %v100_v13 }
  0xe8   :  { %v101_v15 = vld [vmem:[#allocation2 + $0x8] sm:$0xff] }
  0xe9   :  { %v133_v16 = vpack.c.bf16 %v109_v14, %v109_v14  ;;  %v110_v17 = vadd.f32 %v130_v12, %v101_v15 }
  0xeb   :  { %120 = vst.msk [vmem:[%s198_s3] sm:$0xf] %vm119_vm3, %v133_v16  ;;  %v134_v18 = vpack.c.bf16 %v110_v17, %v110_v17 }
  0xed   :  { %121 = vst.msk [vmem:[%s198_s3 + $0x4] sm:$0xf] %vm119_vm3, %v134_v18 }

// kernel: transformer_classifier.10
= control target key start
LH: loop header
LB: loop body
LE: loop exit
PB: predicated region body
PF: predicated region fallthrough
CT: control target
= control target key end

     0   :  { %vm18_vm0 = vcmask 261120   ;;  %vm72_vm1 = vcmask 257024   ;;  %s132_s0 = inlined_call_operand.vmem [shape: bf16[16,32], index: 0, kind: input, shape index: {}]   ;;  %s133_s1 = inlined_call_operand.vmem [shape: f32[1,32], index: 1, kind: input, shape index: {}]   ;;  %s134_s2 = inlined_call_operand.vmem [shape: f32[1,32], index: 2, kind: input, shape index: {}]   ;;  %s135_s3 = inlined_call_operand.vmem [shape: bf16[16,32], index: 3, kind: output, shape index: {}]  }
   0x1   :  { %v86_v0 = vld [vmem:[%s132_s0] sm:$0xff]  }
   0x2   :  { %v87_v1 = vunpack.c.l.bf16 %v86_v0  ;;  %v88_v2 = vunpack.c.h.bf16 %v86_v0  ;;  %v79_v22 = vld [vmem:[%s133_s1] ss:$0 sm:$0xff] }
   0x3   :  { %v80_v24 = vld [vmem:[%s134_s2] ss:$0 sm:$0xff] }
   0x4   :  { %v19_v3 = vsel %vm18_vm0, %v87_v1, 0.0  ;;  %v22_v4 = vsel %vm18_vm0, %v88_v2, 0.0 }
   0x5   :  { %20 = vadd.xlane.f32.xlu0 %v19_v3 }
   0x9   :  { %23 = vadd.xlane.f32.xlu0 %v22_v4 }
  0x92   :  { %v21_v5 = vpop.xlane.xlu0 %20 }
  0x93   :  { %v26_v6 = vmul.f32 0.03125, %v21_v5 }
  0x95   :  { %v28_v7 = vsub.f32 %v87_v1, %v26_v6 }
  0x96   :  { %v24_v8 = vpop.xlane.xlu0 %23 }
  0x97   :  { %v27_v9 = vmul.f32 0.03125, %v24_v8  ;;  %v30_v10 = vmul.f32 %v28_v7, %v28_v7 }
  0x99   :  { %v29_v11 = vsub.f32 %v88_v2, %v27_v9  ;;  %v32_v12 = vsel %vm18_vm0, %v30_v10, 0.0 }
  0x9a   :  { %33 = vadd.xlane.f32.xlu1 %v32_v12 }
  0x9b   :  { %v31_v13 = vmul.f32 %v29_v11, %v29_v11 }
  0x9d   :  { %v35_v14 = vsel %vm18_vm0, %v31_v13, 0.0 }
  0x9e   :  { %36 = vadd.xlane.f32.xlu1 %v35_v14 }
 0x127   :  { %v34_v15 = vpop.xlane.xlu1 %33 }
 0x128   :  { %v38_v16 = vmul.f32 0.03125, %v34_v15 }
 0x12a   :  { %v40_v17 = vadd.f32 1e-12, %v38_v16 }
 0x12b   :  { %v37_v18 = vpop.xlane.xlu1 %36 }
 0x12c   :  { %89 = vrsqrt.f32 %v40_v17  ;;  %v39_v19 = vmul.f32 0.03125, %v37_v18 }
 0x12e   :  { %v41_v20 = vadd.f32 1e-12, %v39_v19 }
 0x130   :  { %91 = vrsqrt.f32 %v41_v20 }
 0x136   :  { %v90_v21 = vpop.eup %89 }
 0x137   :  { %v44_v23 = vmul.f32 %v90_v21, %v28_v7 }
 0x139   :  { %v53_v25 = vmul.f32 %v79_v22, %v44_v23 }
 0x13a   :  { %v92_v26 = vpop.eup %91 }
 0x13b   :  { %v62_v27 = vadd.f32 %v80_v24, %v53_v25  ;;  %v45_v28 = vmul.f32 %v92_v26, %v29_v11 }
 0x13d   :  { %v83_v29 = vpack.c.bf16 %v62_v27, %v62_v27  ;;  %v54_v30 = vmul.f32 %v79_v22, %v45_v28 }
 0x13f   :  { %73 = vst.msk [vmem:[%s135_s3] sm:$0xf] %vm72_vm1, %v83_v29  ;;  %v63_v31 = vadd.f32 %v80_v24, %v54_v30 }
 0x141   :  { %v84_v32 = vpack.c.bf16 %v63_v31, %v63_v31 }
 0x143   :  { %74 = vst.msk [vmem:[%s135_s3 + $0x4] sm:$0xf] %vm72_vm1, %v84_v32 }

// kernel: transformer_classifier.13
= control target key start
LH: loop header
LB: loop body
LE: loop exit
PB: predicated region body
PF: predicated region fallthrough
CT: control target
= control target key end

     0   :  { %vm28_vm0 = vcmask 261120   ;;  %v220_v0 = vmov 0.0   ;;  %vm221_vm1 = vmmov 0   ;;  %vm178_vm2 = vcmask 257024   ;;  %s293_s1 = inlined_call_operand.vmem [shape: bf16[32,32], index: 1, kind: input, shape index: {}]   ;;  %s294_s0 = inlined_call_operand.vmem [shape: bf16[16,32], index: 0, kind: input, shape index: {}]   ;;  %s295_s3 = inlined_call_operand.vmem [shape: bf16[16,32], index: 3, kind: input, shape index: {}]   ;;  %s296_s2 = inlined_call_operand.vmem [shape: f32[1,32], index: 2, kind: input, shape index: {}]   ;;  %s297_s4 = inlined_call_operand.vmem [shape: f32[1,32], index: 4, kind: input, shape index: {}]   ;;  %s298_s5 = inlined_call_operand.vmem [shape: f32[1,32], index: 5, kind: input, shape index: {}]   ;;  %s299_s6 = inlined_call_operand.vmem [shape: bf16[16,32], index: 6, kind: output, shape index: {}]  }
   0x1   :  { %203 = vmatprep.subr.bf16.mxu0 %v220_v0  ;;  %v213_v1 = vld [vmem:[%s293_s1] sm:$0xff]   ;;  %207 = vmatprep.mubr.msk.bf16.mxu0 %vm221_vm1, %v220_v0  ;;  %29 = vst.msk [vmem:[#allocation2] sm:$0xff] %vm28_vm0, %v220_v0  ;;  %30 = vst.msk [vmem:[#allocation2 + $0x8] sm:$0xff] %vm28_vm0, %v220_v0  ;;  %v214_v2 = vld [vmem:[%s293_s1 + $0x8] sm:$0xff]  }
   0x2   :  { %204 = vmatpush3.bf16.msra.mxu0 %v213_v1  ;;  %v215_v3 = vld [vmem:[%s294_s0] sm:$0xff]  }
   0x3   :  { %205 = vmatprep.subr.bf16.mxu0 %v220_v0  ;;  %v197_v12 = vld [vmem:[%s295_s3] sm:$0xff]  }
   0x4   :  { %v189_v13 = vld [vmem:[%s296_s2] ss:$0 sm:$0xff]  ;;  %v198_v14 = vunpack.c.l.bf16 %v197_v12  ;;  %v199_v17 = vunpack.c.h.bf16 %v197_v12 }
   0x5   :  { %v190_v41 = vld [vmem:[%s297_s4] ss:$0 sm:$0xff] }
   0x6   :  { %206 = vmatpush3.bf16.msra.mxu0 %v214_v2  ;;  %v191_v43 = vld [vmem:[%s298_s5] ss:$0 sm:$0xff] }
   0x8   :  { %v31_v4 = vld [vmem:[#allocation2] sm:$0xff]  ;;  %v32_v6 = vld [vmem:[#allocation2 + $0x8] sm:$0xff] }
   0x9   :  { %208 = vmatmul.mubr.msk.bf16.vlgmr.msra.gmra.mrb[0].mxu0 %vm28_vm0, %v215_v3 }
  0xdc   :  { %v94_v5 = vpop.f32.mrb[0].mxu0 }
  0xdd   :  { %v101_v7 = vadd.f32 %v94_v5, %v31_v4  ;;  %v209_v8 = vpop.f32.mrb[1].mxu0 }
  0xde   :  { %v97_v9 = vpop.f32.mrb[2].mxu0 }
  0xdf   :  { %103 = vst.msk [vmem:[#allocation2] sm:$0xff] %vm28_vm0, %v101_v7  ;;  %v102_v10 = vadd.f32 %v97_v9, %v32_v6  ;;  %v210_v11 = vpop.f32.mrb[3].mxu0 }
  0xe1   :  { %104 = vst.msk [vmem:[#allocation2 + $0x8] sm:$0xff] %vm28_vm0, %v102_v10 }
  0xe6   :  { %v108_v15 = vld [vmem:[#allocation2] sm:$0xff] }
  0xe7   :  { %v117_v16 = vadd.f32 %v189_v13, %v108_v15 }
  0xe8   :  { %v109_v18 = vld [vmem:[#allocation2 + $0x8] sm:$0xff] }
  0xe9   :  { %v123_v19 = vadd.f32 %v198_v14, %v117_v16  ;;  %v118_v20 = vadd.f32 %v189_v13, %v109_v18 }
  0xeb   :  { %v125_v21 = vsel %vm28_vm0, %v123_v19, 0.0  ;;  %v124_v22 = vadd.f32 %v199_v17, %v118_v20 }
  0xec   :  { %126 = vadd.xlane.f32.xlu0 %v125_v21 }
  0xed   :  { %v128_v23 = vsel %vm28_vm0, %v124_v22, 0.0 }
  0xf0   :  { %129 = vadd.xlane.f32.xlu0 %v128_v23 }
 0x179   :  { %v127_v24 = vpop.xlane.xlu0 %126 }
 0x17a   :  { %v132_v25 = vmul.f32 0.03125, %v127_v24 }
 0x17c   :  { %v134_v26 = vsub.f32 %v123_v19, %v132_v25 }
 0x17d   :  { %v130_v27 = vpop.xlane.xlu0 %129 }
 0x17e   :  { %v133_v28 = vmul.f32 0.03125, %v130_v27  ;;  %v136_v29 = vmul.f32 %v134_v26, %v134_v26 }
 0x180   :  { %v135_v30 = vsub.f32 %v124_v22, %v133_v28  ;;  %v138_v31 = vsel %vm28_vm0, %v136_v29, 0.0 }
 0x181   :  { %139 = vadd.xlane.f32.xlu1 %v138_v31 }
 0x182   :  { %v137_v32 = vmul.f32 %v135_v30, %v135_v30 }
 0x184   :  { %v141_v33 = vsel %vm28_vm0, %v137_v32, 0.0 }
 0x185   :  { %142 = vadd.xlane.f32.xlu1 %v141_v33 }
 0x20e   :  { %v140_v34 = vpop.xlane.xlu1 %139 }
 0x20f   :  { %v144_v35 = vmul.f32 0.03125, %v140_v34 }
 0x211   :  { %v146_v36 = vadd.f32 1e-12, %v144_v35 }
 0x212   :  { %v143_v37 = vpop.xlane.xlu1 %142 }
 0x213   :  { %216 = vrsqrt.f32 %v146_v36  ;;  %v145_v38 = vmul.f32 0.03125, %v143_v37 }
 0x215   :  { %v147_v39 = vadd.f32 1e-12, %v145_v38 }
 0x217   :  { %218 = vrsqrt.f32 %v147_v39 }
 0x21d   :  { %v217_v40 = vpop.eup %216 }
 0x21e   :  { %v150_v42 = vmul.f32 %v217_v40, %v134_v26 }
 0x220   :  { %v159_v44 = vmul.f32 %v190_v41, %v150_v42 }
 0x221   :  { %v219_v45 = vpop.eup %218 }
 0x222   :  { %v168_v46 = vadd.f32 %v191_v43, %v159_v44  ;;  %v151_v47 = vmul.f32 %v219_v45, %v135_v30 }
 0x224   :  { %v194_v48 = vpack.c.bf16 %v168_v46, %v168_v46  ;;  %v160_v49 = vmul.f32 %v190_v41, %v151_v47 }
 0x226   :  { %179 = vst.msk [vmem:[%s299_s6] sm:$0xf] %vm178_vm2, %v194_v48  ;;  %v169_v50 = vadd.f32 %v191_v43, %v160_v49 }
 0x228   :  { %v195_v51 = vpack.c.bf16 %v169_v50, %v169_v50 }
 0x22a   :  { %180 = vst.msk [vmem:[%s299_s6 + $0x4] sm:$0xf] %vm178_vm2, %v195_v51 }

// kernel: transformer_classifier.19
= control target key start
LH: loop header
LB: loop body
LE: loop exit
PB: predicated region body
PF: predicated region fallthrough
CT: control target
= control target key end

     0   :  { %v144_v1 = vmov 0.0   ;;  %vm145_vm0 = vmmov 0   ;;  %s191_s0 = inlined_call_operand.vmem [shape: bf16[2,32], index: 0, kind: input, shape index: {}]   ;;  %s192_s1 = inlined_call_operand.vmem [shape: bf16[32,3], index: 1, kind: input, shape index: {}]   ;;  %s193_s2 = inlined_call_operand.vmem [shape: f32[1,3], index: 2, kind: input, shape index: {}]   ;;  %s194_s3 = inlined_call_operand.hbm [shape: f32[2,3], index: 3, kind: output, shape index: {}]  }
   0x1   :  { %v118_v0 = vld [vmem:[%s192_s1] sm:$0xff]   ;;  %107 = vmatprep.subr.bf16.mxu0 %v144_v1  ;;  %v119_v2 = vld [vmem:[%s192_s1 + $0x8] sm:$0xff]   ;;  %111 = vmatprep.mubr.msk.bf16.mxu0 %vm145_vm0, %v144_v1 }
   0x2   :  { %108 = vmatpush3.bf16.msra.mxu0 %v118_v0 }
   0x3   :  { %109 = vmatprep.subr.bf16.mxu0 %v144_v1 }
   0x4   :  { %8 = vsyncpa [#allocation3], 0  ;;  %v16_v3 = vld [vmem:[%s191_s0] sm:$0x1]  ;;  %vm40_vm1 = vcmask 261120   ;;  %s146_s20 = smov [#allocation2]  }
   0x5   :  { %v100_v4 = vld [vmem:[%s193_s2] ss:$0 sm:$0xff]  ;;  %s92_s21 = sshll.u32 %s146_s20, 4  ;;  %vm84_vm2 = vcmask 17408   ;;  %s93_s21 = int_to_ptr.vmem [resolvable:$true] %s92_s21 }
   0x6   :  { %110 = vmatpush3.bf16.msra.mxu0 %v119_v2  ;;  %s120_s1 = scalar_lea.vmem %s93_s21, 32  ;;  %p125_p1 = scmp.lt.s32.totalorder %s93_s21, %s93_s21 }
   0x7   :  { %p121_p0 = scmp.ne.s32.totalorder %s93_s21, %s120_s1  ;;  %p126_p2 = scmp.lt.s32.totalorder %s120_s1, %s120_s1 }
   0x9   :  { %112 = vmatmul.mubr.msk.bf16.vlgmr.msra.gmra.mrb[0].mxu0 %vm40_vm1, %v16_v3  ;;  %p127_p3 = por %p126_p2, %p125_p1 }
   0xb   :  { %p128_p4 = pnand %p127_p3, %p121_p0 }
  0xdc   :  { %v78_v5 = vpop.f32.mrb[0].mxu0 }
  0xdd   :  { %v79_v6 = vadd.f32 %v100_v4, %v78_v5  ;;  %v113_v7 = vpop.f32.mrb[1].mxu0 }
  0xde   :  { %v81_v8 = vpop.f32.mrb[2].mxu0 }
  0xdf   :  { %v114_v9 = vpop.f32.mrb[3].mxu0  ;;  %85 = vst.msk [vmem:[#allocation2] sm:$0x3] %vm84_vm2, %v79_v6 }
  0xe0   :  { %131 = shalt.err (!%p128_p4)
}
  0xe1   :  { %s132_s2 = scalar_lea.hbm %s194_s3, 32 }
  0xe2   :  { %p133_p5 = scmp.ne.s32.totalorder %s194_s3, %s132_s2  ;;  %p136_p6 = scmp.lt.u32.totalorder %s132_s2, %s194_s3 }
  0xe4   :  { %p138_p7 = pnand %p136_p6, %p133_p5 }
  0xe6   :  { %141 = shalt.err (!%p138_p7)
}
  0xe7   :  { %95 = dma.vmem_to_hbm [thread:$0]  %s93_s21, 32, %s194_s3, [#allocation3]  }
  0xe8   :  { %142 = dma.done.wait [#allocation3], 32  }
  0xe9   :  { %143 = vsyncadd [#allocation3], 4294967264 }
  0xea   :  { %99 = vsyncpa [#allocation3], 1 }

// kernel: transformer_classifier.14
= control target key start
LH: loop header
LB: loop body
LE: loop exit
PB: predicated region body
PF: predicated region fallthrough
CT: control target
= control target key end

     0   :  { %vm34_vm0 = vcmask 261120   ;;  %v360_v0 = vmov 0.0   ;;  %vm361_vm1 = vmmov 0   ;;  %vm165_vm2 = vcmask 523264   ;;  %s458_s1 = inlined_call_operand.vmem [shape: bf16[32,64], index: 1, kind: input, shape index: {}]   ;;  %s459_s0 = inlined_call_operand.vmem [shape: bf16[16,32], index: 0, kind: input, shape index: {}, may-alias: {0,5}]   ;;  %s460_s3 = inlined_call_operand.vmem [shape: bf16[64,32], index: 3, kind: input, shape index: {}]   ;;  %s461_s2 = inlined_call_operand.vmem [shape: f32[1,64], index: 2, kind: input, shape index: {}]   ;;  %s462_s5 = inlined_call_operand.vmem [shape: bf16[16,32], index: 5, kind: input, shape index: {}, may-alias: {0,5}]   ;;  %s463_s4 = inlined_call_operand.vmem [shape: f32[1,32], index: 4, kind: input, shape index: {}]   ;;  %s464_s6 = inlined_call_operand.vmem [shape: f32[1,32], index: 6, kind: input, shape index: {}]   ;;  %s465_s7 = inlined_call_operand.vmem [shape: f32[1,32], index: 7, kind: input, shape index: {}]   ;;  %s466_s8 = inlined_call_operand.vmem [shape: bf16[16,32], index: 8, kind: output, shape index: {}]  }
   0x1   :  { %323 = vmatprep.subr.bf16.mxu0 %v360_v0  ;;  %v345_v1 = vld [vmem:[%s458_s1] sm:$0xff]   ;;  %327 = vmatprep.mubr.msk.bf16.mxu0 %vm361_vm1, %v360_v0  ;;  %35 = vst.msk [vmem:[#allocation2] sm:$0xff] %vm34_vm0, %v360_v0  ;;  %36 = vst.msk [vmem:[#allocation2 + $0x8] sm:$0xff] %vm34_vm0, %v360_v0  ;;  %v346_v2 = vld [vmem:[%s458_s1 + $0x8] sm:$0xff]   ;;  %vm287_vm3 = vcmask 257024  }
   0x2   :  { %331 = vmatprep.subr.bf16.mxu1 %v360_v0  ;;  %339 = vmatprep.mubr.msk.bf16.mxu1 %vm361_vm1, %v360_v0  ;;  %v347_v3 = vld [vmem:[%s459_s0] sm:$0xff]   ;;  %v349_v5 = vld [vmem:[%s460_s3 + $0x8] sm:$0xff]   ;;  %v350_v6 = vld [vmem:[%s460_s3 + $0x10] sm:$0xff]  }
   0x3   :  { %324 = vmatpush3.bf16.msra.mxu0 %v345_v1  ;;  %v348_v4 = vld [vmem:[%s460_s3] sm:$0xff]   ;;  %v351_v7 = vld [vmem:[%s460_s3 + $0x18] sm:$0xff]  }
   0x4   :  { %325 = vmatprep.subr.bf16.mxu0 %v360_v0  ;;  %332 = vmatpush3.bf16.msra.mxu1 %v348_v4  ;;  %v294_v8 = vld [vmem:[%s461_s2] ss:$0 sm:$0xff] }
   0x5   :  { %333 = vmatprep.subr.bf16.mxu1 %v360_v0  ;;  %v312_v42 = vld [vmem:[%s462_s5] sm:$0xff]  }
   0x6   :  { %v304_v43 = vld [vmem:[%s463_s4] ss:$0 sm:$0xff]  ;;  %v313_v44 = vunpack.c.l.bf16 %v312_v42  ;;  %v314_v47 = vunpack.c.h.bf16 %v312_v42 }
   0x7   :  { %326 = vmatpush3.bf16.msra.mxu0 %v346_v2 }
   0x8   :  { %334 = vmatpush3.bf16.msra.mxu1 %v349_v5  ;;  %v130_v34 = vld [vmem:[#allocation2] sm:$0xff]  ;;  %v131_v36 = vld [vmem:[#allocation2 + $0x8] sm:$0xff] }
   0x9   :  { %335 = vmatprep.subr.bf16.mxu1 %v360_v0 }
   0xa   :  { %328 = vmatmul.mubr.msk.bf16.vlgmr.msra.gmra.mrb[0].mxu0 %vm34_vm0, %v347_v3 }
   0xc   :  { %336 = vmatpush3.bf16.msra.mxu1 %v350_v6 }
   0xd   :  { %337 = vmatprep.subr.bf16.mxu1 %v360_v0 }
  0x10   :  { %338 = vmatpush3.bf16.msra.mxu1 %v351_v7  ;;  %v305_v7 = vld [vmem:[%s464_s6] ss:$0 sm:$0xff] }
  0xdd   :  { %v105_v9 = vpop.f32.mrb[0].mxu0 }
  0xde   :  { %v106_v10 = vadd.f32 %v294_v8, %v105_v9  ;;  %v329_v11 = vpop.f32.mrb[1].mxu0  ;;  %v306_v9 = vld [vmem:[%s465_s7] ss:$0 sm:$0xff] }
  0xdf   :  { %v108_v12 = vpop.f32.mrb[2].mxu0 }
  0xe0   :  { %v112_v13 = vmul.f32 %v106_v10, %v106_v10  ;;  %v109_v14 = vadd.f32 %v294_v8, %v108_v12  ;;  %v330_v15 = vpop.f32.mrb[3].mxu0 }
  0xe2   :  { %v114_v16 = vmul.f32 %v112_v13, %v106_v10  ;;  %v113_v17 = vmul.f32 %v109_v14, %v109_v14 }
  0xe4   :  { %v116_v18 = vmul.f32 0.044715, %v114_v16  ;;  %v115_v19 = vmul.f32 %v113_v17, %v109_v14 }
  0xe6   :  { %v118_v20 = vadd.f32 %v116_v18, %v106_v10  ;;  %v117_v21 = vmul.f32 0.044715, %v115_v19 }
  0xe8   :  { %v120_v22 = vmul.f32 0.7978846, %v118_v20  ;;  %v119_v23 = vadd.f32 %v117_v21, %v109_v14 }
  0xea   :  { %352 = vtanh.f32 %v120_v22  ;;  %v121_v24 = vmul.f32 0.7978846, %v119_v23 }
  0xec   :  { %354 = vtanh.f32 %v121_v24 }
  0xf4   :  { %v353_v25 = vpop.eup %352 }
  0xf5   :  { %v124_v26 = vadd.f32 1.0, %v353_v25 }
  0xf6   :  { %v355_v27 = vpop.eup %354 }
  0xf7   :  { %v126_v28 = vmul.f32 0.5, %v124_v26  ;;  %v125_v29 = vadd.f32 1.0, %v355_v27 }
  0xf9   :  { %v127_v30 = vmul.f32 0.5, %v125_v29  ;;  %v128_v31 = vmul.f32 %v126_v28, %v106_v10 }
  0xfb   :  { %v129_v32 = vmul.f32 %v127_v30, %v109_v14 }
  0xfd   :  { %v132_v33 = vpack.c.bf16 %v129_v32, %v128_v31 }
  0xff   :  { %340 = vmatmul.mubr.msk.bf16.vlgmr.msra.gmra.mrb[0].mxu1 %vm165_vm2, %v132_v33 }
 0x1d2   :  { %v203_v35 = vpop.f32.mrb[0].mxu1 }
 0x1d3   :  { %v210_v37 = vadd.f32 %v203_v35, %v130_v34  ;;  %v341_v38 = vpop.f32.mrb[1].mxu1 }
 0x1d4   :  { %v206_v39 = vpop.f32.mrb[2].mxu1 }
 0x1d5   :  { %212 = vst.msk [vmem:[#allocation2] sm:$0xff] %vm34_vm0, %v210_v37  ;;  %v211_v40 = vadd.f32 %v206_v39, %v131_v36  ;;  %v342_v41 = vpop.f32.mrb[3].mxu1 }
 0x1d7   :  { %213 = vst.msk [vmem:[#allocation2 + $0x8] sm:$0xff] %vm34_vm0, %v211_v40 }
 0x1dc   :  { %v217_v45 = vld [vmem:[#allocation2] sm:$0xff] }
 0x1dd   :  { %v226_v46 = vadd.f32 %v304_v43, %v217_v45 }
 0x1de   :  { %v218_v48 = vld [vmem:[#allocation2 + $0x8] sm:$0xff] }
 0x1df   :  { %v232_v49 = vadd.f32 %v313_v44, %v226_v46  ;;  %v227_v50 = vadd.f32 %v304_v43, %v218_v48 }
 0x1e1   :  { %v234_v51 = vsel %vm34_vm0, %v232_v49, 0.0  ;;  %v233_v52 = vadd.f32 %v314_v47, %v227_v50 }
 0x1e2   :  { %235 = vadd.xlane.f32.xlu0 %v234_v51 }
 0x1e3   :  { %v237_v53 = vsel %vm34_vm0, %v233_v52, 0.0 }
 0x1e6   :  { %238 = vadd.xlane.f32.xlu0 %v237_v53 }
 0x26f   :  { %v236_v54 = vpop.xlane.xlu0 %235 }
 0x270   :  { %v241_v55 = vmul.f32 0.03125, %v236_v54 }
 0x272   :  { %v243_v56 = vsub.f32 %v232_v49, %v241_v55 }
 0x273   :  { %v239_v57 = vpop.xlane.xlu0 %238 }
 0x274   :  { %v242_v58 = vmul.f32 0.03125, %v239_v57  ;;  %v245_v59 = vmul.f32 %v243_v56, %v243_v56 }
 0x276   :  { %v244_v60 = vsub.f32 %v233_v52, %v242_v58  ;;  %v247_v61 = vsel %vm34_vm0, %v245_v59, 0.0 }
 0x277   :  { %248 = vadd.xlane.f32.xlu1 %v247_v61 }
 0x278   :  { %v246_v62 = vmul.f32 %v244_v60, %v244_v60 }
 0x27a   :  { %v250_v63 = vsel %vm34_vm0, %v246_v62, 0.0 }
 0x27b   :  { %251 = vadd.xlane.f32.xlu1 %v250_v63 }
 0x304   :  { %v249_v0 = vpop.xlane.xlu1 %248 }
 0x305   :  { %v253_v1 = vmul.f32 0.03125, %v249_v0 }
 0x307   :  { %v255_v2 = vadd.f32 1e-12, %v253_v1 }
 0x308   :  { %v252_v3 = vpop.xlane.xlu1 %251 }
 0x309   :  { %356 = vrsqrt.f32 %v255_v2  ;;  %v254_v4 = vmul.f32 0.03125, %v252_v3 }
 0x30b   :  { %v256_v5 = vadd.f32 1e-12, %v254_v4 }
 0x30d   :  { %358 = vrsqrt.f32 %v256_v5 }
 0x313   :  { %v357_v6 = vpop.eup %356 }
 0x314   :  { %v259_v8 = vmul.f32 %v357_v6, %v243_v56 }
 0x316   :  { %v268_v10 = vmul.f32 %v305_v7, %v259_v8 }
 0x317   :  { %v359_v11 = vpop.eup %358 }
 0x318   :  { %v277_v12 = vadd.f32 %v306_v9, %v268_v10  ;;  %v260_v13 = vmul.f32 %v359_v11, %v244_v60 }
 0x31a   :  { %v309_v14 = vpack.c.bf16 %v277_v12, %v277_v12  ;;  %v269_v15 = vmul.f32 %v305_v7, %v260_v13 }
 0x31c   :  { %288 = vst.msk [vmem:[%s466_s8] sm:$0xf] %vm287_vm3, %v309_v14  ;;  %v278_v16 = vadd.f32 %v306_v9, %v269_v15 }
 0x31e   :  { %v310_v17 = vpack.c.bf16 %v278_v16, %v278_v16 }
 0x320   :  { %289 = vst.msk [vmem:[%s466_s8 + $0x4] sm:$0xf] %vm287_vm3, %v310_v17 }

</bundles_post_ra>
